<compile_context>
chip_gen: v6e
topology: v6e:2x2x1
jax: 0.10.0
libtpu: 0.0.40
codegen_flags: <defaults>
</compile_context>

<pallas_src>
import functools
import math

import jax
import jax.numpy as jnp
from jax.experimental import pallas as pl
from jax.experimental.pallas import tpu as pltpu


def _round_up(x, m):
    return ((x + m - 1) // m) * m


def _stft_mag_kernel(x_ref, basis_ref, out_ref, *, frames_per_tile, r_chunks, f_pad):
    """One grid step: `frames_per_tile` frames for one block of signal rows.

    x_ref:     [n_chunks, rows_block, hop_pad]   bf16 hop-aligned chunks
                                                 (resident across the frame axis)
    basis_ref: [r_chunks, hop_pad, 2*f_pad]      bf16 fused [cos | -sin] DFT basis,
                                                 split per hop chunk
    out_ref:   [rows_block, frames_per_tile*f_pad]  f32 lane-dense magnitudes
    """
    base = pl.program_id(1) * frames_per_tile      # first frame (== first chunk) of tile
    for nl in range(frames_per_tile):              # small static unroll
        # frame (base+nl) = sum over chunks k of chunk[base+nl+k] @ basis_chunk[k]
        reim = jnp.dot(x_ref[base + nl], basis_ref[0],
                       preferred_element_type=jnp.float32)
        for k in range(1, r_chunks):
            reim += jnp.dot(x_ref[base + nl + k], basis_ref[k],
                            preferred_element_type=jnp.float32)
        re = reim[:, :f_pad]                       # 128-aligned lane split
        im = reim[:, f_pad:]
        out_ref[:, nl * f_pad:(nl + 1) * f_pad] = jnp.sqrt(re * re + im * im)


def _pick_rows_block(M, n_chunks, hop_pad, frames_per_tile, f_pad, r_chunks,
                     budget_bytes=40 << 20):
    """Pick rows_block: fit the (double-buffered) VMEM budget, minimize padding."""
    def working_set(rb):
        x_b = 2 * n_chunks * rb * hop_pad * 2            # bf16 signal, double-buffered
        o_b = 2 * rb * frames_per_tile * f_pad * 4       # f32 output, double-buffered
        b_b = 2 * r_chunks * hop_pad * 2 * f_pad * 2     # bf16 basis, double-buffered
        tmp = 4 * rb * 2 * f_pad * 4                     # reim / re / im / mag temporaries
        return x_b + o_b + b_b + tmp

    candidates = [rb for rb in (256, 128, 64, 32, 16)
                  if working_set(rb) <= budget_bytes]
    if not candidates:
        # TODO(synk): for extreme T the resident chunked row block no longer fits;
        # tile the chunk axis (duplicating boundary chunks) instead of the rows.
        rb = 16
        return rb, working_set(rb)
    rb = min(candidates, key=lambda r: (_round_up(M, r), -r))
    return rb, working_set(rb)


def _stft_magnitude_pallas(x3d, basis, *, n_row_tiles, n_frame_tiles, rows_block,
                           frames_per_tile, f_pad, r_chunks, vmem_limit_bytes):
    n_chunks, Mp, hop_pad = x3d.shape
    n_frames_pad = n_frame_tiles * frames_per_tile

    kernel = functools.partial(
        _stft_mag_kernel, frames_per_tile=frames_per_tile,
        r_chunks=r_chunks, f_pad=f_pad)

    cost = pl.CostEstimate(
        flops=(2 * Mp * n_frames_pad * r_chunks * hop_pad * (2 * f_pad)
               + 3 * Mp * n_frames_pad * f_pad),
        transcendentals=Mp * n_frames_pad * f_pad,       # sqrt
        bytes_accessed=(x3d.size * 2 + basis.size * 2
                        + Mp * n_frames_pad * f_pad * 4),
    )

    return pl.pallas_call(
        kernel,
        out_shape=jax.ShapeDtypeStruct((Mp, n_frames_pad * f_pad), jnp.float32),
        grid_spec=pltpu.PrefetchScalarGridSpec(
            num_scalar_prefetch=0,
            grid=(n_row_tiles, n_frame_tiles),
            in_specs=[
                # signal rows: index_map independent of the frame axis -> fetched
                # once per row block and kept resident across all frame tiles
                pl.BlockSpec((n_chunks, rows_block, hop_pad), lambda i, j: (0, i, 0)),
                # invariant DFT basis (small; double-buffer overhead is negligible)
                pl.BlockSpec((r_chunks, hop_pad, 2 * f_pad), lambda i, j: (0, 0, 0)),
            ],
            out_specs=pl.BlockSpec((rows_block, frames_per_tile * f_pad),
                                   lambda i, j: (i, j)),
        ),
        compiler_params=pltpu.CompilerParams(
            dimension_semantics=("parallel", "arbitrary"),
            vmem_limit_bytes=int(vmem_limit_bytes)),
        cost_estimate=cost,
    )(x3d, basis)


@functools.partial(jax.jit, static_argnames=("n_fft", "hop_length"))
def eeg2vid_encoder_forward(x, *, n_fft=200, hop_length=100):
    """x: [B, C, T] float32 -> [B, 1, N, F, C] float32."""
    B, C, T = x.shape
    if T < n_fft:
        raise ValueError(f"time dim {T} is shorter than n_fft={n_fft}")
    hop = hop_length
    n_frames = 1 + (T - n_fft) // hop
    F = n_fft // 2 + 1

    f_pad = _round_up(F, 128)               # lane-dense output frequency width
    hop_pad = _round_up(hop, 128)           # lane-aligned chunk width
    r_chunks = -(-n_fft // hop)             # chunks per frame (ceil)
    frames_per_tile = 8
    n_frames_pad = _round_up(n_frames, frames_per_tile)
    n_frame_tiles = n_frames_pad // frames_per_tile
    n_chunks = n_frames_pad + r_chunks - 1  # chunks needed incl. padded frames

    # ---- tiling / VMEM sizing (v7x-safe budget, minimal row padding) -----
    M = B * C
    rows_block, ws_bytes = _pick_rows_block(
        M, n_chunks, hop_pad, frames_per_tile, f_pad, r_chunks)
    Mp = _round_up(M, rows_block)
    vmem_limit = max(ws_bytes + (4 << 20), 16 << 20)

    # ---- signal re-layout: hop-aligned bf16 chunks [n_chunks, Mp, hop_pad]
    x2d = x.reshape(M, T).astype(jnp.float32)
    t_need = n_chunks * hop
    if t_need <= T:
        x2d = x2d[:, :t_need]               # tail samples never enter any frame
    else:
        x2d = jnp.pad(x2d, ((0, 0), (0, t_need - T)))
    x3d = x2d.reshape(M, n_chunks, hop)
    x3d = jnp.pad(x3d, ((0, Mp - M), (0, 0), (0, hop_pad - hop)))
    x3d = jnp.transpose(x3d, (1, 0, 2)).astype(jnp.bfloat16)   # [n_chunks, Mp, hop_pad]

    # ---- per-chunk one-sided DFT basis [r_chunks, hop_pad, 2*f_pad] ------
    # basis_full[t, :] handles sample t of a frame; rows >= n_fft are zero,
    # so frames decompose exactly as sums of hop-aligned chunk matmuls.
    n_idx = jnp.arange(n_fft, dtype=jnp.float32)
    k_idx = jnp.arange(F, dtype=jnp.float32)
    ang = (2.0 * math.pi / n_fft) * n_idx[:, None] * k_idx[None, :]   # [n_fft, F]
    basis = jnp.zeros((r_chunks * hop, 2 * f_pad), jnp.float32)
    basis = basis.at[:n_fft, :F].set(jnp.cos(ang))
    basis = basis.at[:n_fft, f_pad:f_pad + F].set(-jnp.sin(ang))      # exp(-i*ang)
    basis = basis.reshape(r_chunks, hop, 2 * f_pad)
    basis = jnp.pad(basis, ((0, 0), (0, hop_pad - hop), (0, 0)))
    basis = basis.astype(jnp.bfloat16)

    # ---- hot path: Pallas STFT-magnitude ---------------------------------
    out = _stft_magnitude_pallas(
        x3d, basis, n_row_tiles=Mp // rows_block, n_frame_tiles=n_frame_tiles,
        rows_block=rows_block, frames_per_tile=frames_per_tile, f_pad=f_pad,
        r_chunks=r_chunks, vmem_limit_bytes=vmem_limit)   # [Mp, n_frames_pad*f_pad]

    # ---- glue: drop padding, reshape/permute to the torch output layout --
    mag = out.reshape(Mp, n_frames_pad, f_pad)[:M, :n_frames, :F]     # [M, N, F]
    mag = mag.reshape(B, C, n_frames, F)                              # [B, C, N, F]
    # NOTE: this transpose is an extra HBM round-trip of the output; it is kept
    # only because the module interface requires [B, 1, N, F, C].
    emb = jnp.transpose(mag, (0, 2, 3, 1))                            # [B, N, F, C]
    return emb[:, None]                                               # [B, 1, N, F, C]


if __name__ == "__main__":
    # Small shapes consistent with the module's forward (x: [batch, channel, time]).
    B, C, T = 2, 4, 64
    n_fft, hop_length = 16, 8     # scaled-down versions of the defaults (200, 100)

    key = jax.random.PRNGKey(0)
    x = jax.random.normal(key, (B, C, T), dtype=jnp.float32)

    out = eeg2vid_encoder_forward(x, n_fft=n_fft, hop_length=hop_length)
    out = jax.block_until_ready(out)

    # Shape check: [B, 1, N, F, C]
    n_frames = 1 + (T - n_fft) // hop_length
    F = n_fft // 2 + 1
    assert out.shape == (B, 1, n_frames, F, C), out.shape

    # Numerical self-check against a pure-JAX rFFT reference
    # (torch.stft(window=None, center=False, onesided=True) magnitude).
    starts = jnp.arange(n_frames) * hop_length
    idx = starts[:, None] + jnp.arange(n_fft)[None, :]
    frames = x[:, :, idx]                                          # [B, C, N, n_fft]
    ref = jnp.abs(jnp.fft.rfft(frames, n=n_fft, axis=-1))          # [B, C, N, F]
    ref = jnp.transpose(ref, (0, 2, 3, 1))[:, None]                # [B, 1, N, F, C]

    # bf16 MXU inputs -> compare against the global magnitude scale.
    err = float(jnp.max(jnp.abs(out - ref)))
    scale = float(jnp.max(jnp.abs(ref)))
    assert err <= 2e-2 * scale + 1e-3, (err, scale)

    print("KERNEL_OK")
</pallas_src>

<mosaic_0001>
module attributes {stable_mosaic.version = 11 : i64} {
  func.func @_stft_mag_kernel(%arg0: i32, %arg1: i32, %arg2: memref<9x16x128xbf16, #tpu.memory_space<vmem>>, %arg3: memref<2x128x256xbf16, #tpu.memory_space<vmem>>, %arg4: memref<16x1024xf32, #tpu.memory_space<vmem>>) attributes {dimension_semantics = [#tpu.dimension_semantics<parallel>, #tpu.dimension_semantics<arbitrary>], iteration_bounds = array<i64: 1, 1>, scalar_prefetch = 0 : i64, scratch_operands = 0 : i64, tpu.core_type = #tpu.core_type<tc>, window_params = [{transform_indices = @transform_0, window_bounds = array<i64: 9, 16, 128>}, {pipeline_mode = #tpu.pipeline_mode<synchronous>, transform_indices = @transform_1, window_bounds = array<i64: 2, 128, 256>}, {transform_indices = @transform_2, window_bounds = array<i64: 16, 1024>}]} {
    %c8_i32 = arith.constant 8 : i32
    %0 = arith.muli %arg1, %c8_i32 : i32
    %c0_i32 = arith.constant 0 : i32
    %1 = arith.addi %0, %c0_i32 : i32
    %2 = arith.index_cast %1 : i32 to index
    %c0 = arith.constant 0 : index
    %c0_0 = arith.constant 0 : index
    %3 = vector.load %arg2[%2, %c0, %c0_0] : memref<9x16x128xbf16, #tpu.memory_space<vmem>>, vector<1x16x128xbf16>
    %4 = vector.shape_cast %3 : vector<1x16x128xbf16> to vector<16x128xbf16>
    %c0_1 = arith.constant 0 : index
    %c0_2 = arith.constant 0 : index
    %c0_3 = arith.constant 0 : index
    %5 = vector.load %arg3[%c0_1, %c0_2, %c0_3] : memref<2x128x256xbf16, #tpu.memory_space<vmem>>, vector<1x128x256xbf16>
    %6 = vector.shape_cast %5 : vector<1x128x256xbf16> to vector<128x256xbf16>
    %cst = arith.constant dense<0.000000e+00> : vector<16x256xf32>
    %7 = tpu.matmul %4, %6, %cst {dimension_numbers = #tpu.dot_dimension_numbers<[1], [0], [0], [1], [0, 0, 1, 1], [], []>} : vector<16x128xbf16>, vector<128x256xbf16>, vector<16x256xf32> -> vector<16x256xf32>
    %c0_i32_4 = arith.constant 0 : i32
    %8 = arith.addi %0, %c0_i32_4 : i32
    %c1_i32 = arith.constant 1 : i32
    %9 = arith.addi %8, %c1_i32 : i32
    %10 = arith.index_cast %9 : i32 to index
    %c0_5 = arith.constant 0 : index
    %c0_6 = arith.constant 0 : index
    %11 = vector.load %arg2[%10, %c0_5, %c0_6] : memref<9x16x128xbf16, #tpu.memory_space<vmem>>, vector<1x16x128xbf16>
    %12 = vector.shape_cast %11 : vector<1x16x128xbf16> to vector<16x128xbf16>
    %c1 = arith.constant 1 : index
    %c0_7 = arith.constant 0 : index
    %c0_8 = arith.constant 0 : index
    %13 = vector.load %arg3[%c1, %c0_7, %c0_8] : memref<2x128x256xbf16, #tpu.memory_space<vmem>>, vector<1x128x256xbf16>
    %14 = vector.shape_cast %13 : vector<1x128x256xbf16> to vector<128x256xbf16>
    %cst_9 = arith.constant dense<0.000000e+00> : vector<16x256xf32>
    %15 = tpu.matmul %12, %14, %cst_9 {dimension_numbers = #tpu.dot_dimension_numbers<[1], [0], [0], [1], [0, 0, 1, 1], [], []>} : vector<16x128xbf16>, vector<128x256xbf16>, vector<16x256xf32> -> vector<16x256xf32>
    %16 = arith.addf %7, %15 : vector<16x256xf32>
    %17 = vector.extract_strided_slice %16 {offsets = [0, 0], sizes = [16, 128], strides = [1, 1]} : vector<16x256xf32> to vector<16x128xf32>
    %18 = vector.extract_strided_slice %16 {offsets = [0, 128], sizes = [16, 128], strides = [1, 1]} : vector<16x256xf32> to vector<16x128xf32>
    %19 = arith.mulf %17, %17 : vector<16x128xf32>
    %20 = arith.mulf %18, %18 : vector<16x128xf32>
    %21 = arith.addf %19, %20 : vector<16x128xf32>
    %22 = math.sqrt %21 : vector<16x128xf32>
    %c0_10 = arith.constant 0 : index
    %c0_11 = arith.constant 0 : index
    %23 = vector.load %arg4[%c0_10, %c0_11] : memref<16x1024xf32, #tpu.memory_space<vmem>>, vector<16x128xf32>
    tpu.vector_store %arg4[%c0_10, %c0_11], %22 {strides = array<i32>} : memref<16x1024xf32, #tpu.memory_space<vmem>>, vector<16x128xf32>,
    %c1_i32_12 = arith.constant 1 : i32
    %24 = arith.addi %0, %c1_i32_12 : i32
    %25 = arith.index_cast %24 : i32 to index
    %c0_13 = arith.constant 0 : index
    %c0_14 = arith.constant 0 : index
    %26 = vector.load %arg2[%25, %c0_13, %c0_14] : memref<9x16x128xbf16, #tpu.memory_space<vmem>>, vector<1x16x128xbf16>
    %27 = vector.shape_cast %26 : vector<1x16x128xbf16> to vector<16x128xbf16>
    %c0_15 = arith.constant 0 : index
    %c0_16 = arith.constant 0 : index
    %c0_17 = arith.constant 0 : index
    %28 = vector.load %arg3[%c0_15, %c0_16, %c0_17] : memref<2x128x256xbf16, #tpu.memory_space<vmem>>, vector<1x128x256xbf16>
    %29 = vector.shape_cast %28 : vector<1x128x256xbf16> to vector<128x256xbf16>
    %cst_18 = arith.constant dense<0.000000e+00> : vector<16x256xf32>
    %30 = tpu.matmul %27, %29, %cst_18 {dimension_numbers = #tpu.dot_dimension_numbers<[1], [0], [0], [1], [0, 0, 1, 1], [], []>} : vector<16x128xbf16>, vector<128x256xbf16>, vector<16x256xf32> -> vector<16x256xf32>
    %c1_i32_19 = arith.constant 1 : i32
    %31 = arith.addi %0, %c1_i32_19 : i32
    %c1_i32_20 = arith.constant 1 : i32
    %32 = arith.addi %31, %c1_i32_20 : i32
    %33 = arith.index_cast %32 : i32 to index
    %c0_21 = arith.constant 0 : index
    %c0_22 = arith.constant 0 : index
    %34 = vector.load %arg2[%33, %c0_21, %c0_22] : memref<9x16x128xbf16, #tpu.memory_space<vmem>>, vector<1x16x128xbf16>
    %35 = vector.shape_cast %34 : vector<1x16x128xbf16> to vector<16x128xbf16>
    %c1_23 = arith.constant 1 : index
    %c0_24 = arith.constant 0 : index
    %c0_25 = arith.constant 0 : index
    %36 = vector.load %arg3[%c1_23, %c0_24, %c0_25] : memref<2x128x256xbf16, #tpu.memory_space<vmem>>, vector<1x128x256xbf16>
    %37 = vector.shape_cast %36 : vector<1x128x256xbf16> to vector<128x256xbf16>
    %cst_26 = arith.constant dense<0.000000e+00> : vector<16x256xf32>
    %38 = tpu.matmul %35, %37, %cst_26 {dimension_numbers = #tpu.dot_dimension_numbers<[1], [0], [0], [1], [0, 0, 1, 1], [], []>} : vector<16x128xbf16>, vector<128x256xbf16>, vector<16x256xf32> -> vector<16x256xf32>
    %39 = arith.addf %30, %38 : vector<16x256xf32>
    %40 = vector.extract_strided_slice %39 {offsets = [0, 0], sizes = [16, 128], strides = [1, 1]} : vector<16x256xf32> to vector<16x128xf32>
    %41 = vector.extract_strided_slice %39 {offsets = [0, 128], sizes = [16, 128], strides = [1, 1]} : vector<16x256xf32> to vector<16x128xf32>
    %42 = arith.mulf %40, %40 : vector<16x128xf32>
    %43 = arith.mulf %41, %41 : vector<16x128xf32>
    %44 = arith.addf %42, %43 : vector<16x128xf32>
    %45 = math.sqrt %44 : vector<16x128xf32>
    %c0_27 = arith.constant 0 : index
    %c128 = arith.constant 128 : index
    %46 = vector.load %arg4[%c0_27, %c128] : memref<16x1024xf32, #tpu.memory_space<vmem>>, vector<16x128xf32>
    tpu.vector_store %arg4[%c0_27, %c128], %45 {strides = array<i32>} : memref<16x1024xf32, #tpu.memory_space<vmem>>, vector<16x128xf32>,
    %c2_i32 = arith.constant 2 : i32
    %47 = arith.addi %0, %c2_i32 : i32
    %48 = arith.index_cast %47 : i32 to index
    %c0_28 = arith.constant 0 : index
    %c0_29 = arith.constant 0 : index
    %49 = vector.load %arg2[%48, %c0_28, %c0_29] : memref<9x16x128xbf16, #tpu.memory_space<vmem>>, vector<1x16x128xbf16>
    %50 = vector.shape_cast %49 : vector<1x16x128xbf16> to vector<16x128xbf16>
    %c0_30 = arith.constant 0 : index
    %c0_31 = arith.constant 0 : index
    %c0_32 = arith.constant 0 : index
    %51 = vector.load %arg3[%c0_30, %c0_31, %c0_32] : memref<2x128x256xbf16, #tpu.memory_space<vmem>>, vector<1x128x256xbf16>
    %52 = vector.shape_cast %51 : vector<1x128x256xbf16> to vector<128x256xbf16>
    %cst_33 = arith.constant dense<0.000000e+00> : vector<16x256xf32>
    %53 = tpu.matmul %50, %52, %cst_33 {dimension_numbers = #tpu.dot_dimension_numbers<[1], [0], [0], [1], [0, 0, 1, 1], [], []>} : vector<16x128xbf16>, vector<128x256xbf16>, vector<16x256xf32> -> vector<16x256xf32>
    %c2_i32_34 = arith.constant 2 : i32
    %54 = arith.addi %0, %c2_i32_34 : i32
    %c1_i32_35 = arith.constant 1 : i32
    %55 = arith.addi %54, %c1_i32_35 : i32
    %56 = arith.index_cast %55 : i32 to index
    %c0_36 = arith.constant 0 : index
    %c0_37 = arith.constant 0 : index
    %57 = vector.load %arg2[%56, %c0_36, %c0_37] : memref<9x16x128xbf16, #tpu.memory_space<vmem>>, vector<1x16x128xbf16>
    %58 = vector.shape_cast %57 : vector<1x16x128xbf16> to vector<16x128xbf16>
    %c1_38 = arith.constant 1 : index
    %c0_39 = arith.constant 0 : index
    %c0_40 = arith.constant 0 : index
    %59 = vector.load %arg3[%c1_38, %c0_39, %c0_40] : memref<2x128x256xbf16, #tpu.memory_space<vmem>>, vector<1x128x256xbf16>
    %60 = vector.shape_cast %59 : vector<1x128x256xbf16> to vector<128x256xbf16>
    %cst_41 = arith.constant dense<0.000000e+00> : vector<16x256xf32>
    %61 = tpu.matmul %58, %60, %cst_41 {dimension_numbers = #tpu.dot_dimension_numbers<[1], [0], [0], [1], [0, 0, 1, 1], [], []>} : vector<16x128xbf16>, vector<128x256xbf16>, vector<16x256xf32> -> vector<16x256xf32>
    %62 = arith.addf %53, %61 : vector<16x256xf32>
    %63 = vector.extract_strided_slice %62 {offsets = [0, 0], sizes = [16, 128], strides = [1, 1]} : vector<16x256xf32> to vector<16x128xf32>
    %64 = vector.extract_strided_slice %62 {offsets = [0, 128], sizes = [16, 128], strides = [1, 1]} : vector<16x256xf32> to vector<16x128xf32>
    %65 = arith.mulf %63, %63 : vector<16x128xf32>
    %66 = arith.mulf %64, %64 : vector<16x128xf32>
    %67 = arith.addf %65, %66 : vector<16x128xf32>
    %68 = math.sqrt %67 : vector<16x128xf32>
    %c0_42 = arith.constant 0 : index
    %c256 = arith.constant 256 : index
    %69 = vector.load %arg4[%c0_42, %c256] : memref<16x1024xf32, #tpu.memory_space<vmem>>, vector<16x128xf32>
    tpu.vector_store %arg4[%c0_42, %c256], %68 {strides = array<i32>} : memref<16x1024xf32, #tpu.memory_space<vmem>>, vector<16x128xf32>,
    %c3_i32 = arith.constant 3 : i32
    %70 = arith.addi %0, %c3_i32 : i32
    %71 = arith.index_cast %70 : i32 to index
    %c0_43 = arith.constant 0 : index
    %c0_44 = arith.constant 0 : index
    %72 = vector.load %arg2[%71, %c0_43, %c0_44] : memref<9x16x128xbf16, #tpu.memory_space<vmem>>, vector<1x16x128xbf16>
    %73 = vector.shape_cast %72 : vector<1x16x128xbf16> to vector<16x128xbf16>
    %c0_45 = arith.constant 0 : index
    %c0_46 = arith.constant 0 : index
    %c0_47 = arith.constant 0 : index
    %74 = vector.load %arg3[%c0_45, %c0_46, %c0_47] : memref<2x128x256xbf16, #tpu.memory_space<vmem>>, vector<1x128x256xbf16>
    %75 = vector.shape_cast %74 : vector<1x128x256xbf16> to vector<128x256xbf16>
    %cst_48 = arith.constant dense<0.000000e+00> : vector<16x256xf32>
    %76 = tpu.matmul %73, %75, %cst_48 {dimension_numbers = #tpu.dot_dimension_numbers<[1], [0], [0], [1], [0, 0, 1, 1], [], []>} : vector<16x128xbf16>, vector<128x256xbf16>, vector<16x256xf32> -> vector<16x256xf32>
    %c3_i32_49 = arith.constant 3 : i32
    %77 = arith.addi %0, %c3_i32_49 : i32
    %c1_i32_50 = arith.constant 1 : i32
    %78 = arith.addi %77, %c1_i32_50 : i32
    %79 = arith.index_cast %78 : i32 to index
    %c0_51 = arith.constant 0 : index
    %c0_52 = arith.constant 0 : index
    %80 = vector.load %arg2[%79, %c0_51, %c0_52] : memref<9x16x128xbf16, #tpu.memory_space<vmem>>, vector<1x16x128xbf16>
    %81 = vector.shape_cast %80 : vector<1x16x128xbf16> to vector<16x128xbf16>
    %c1_53 = arith.constant 1 : index
    %c0_54 = arith.constant 0 : index
    %c0_55 = arith.constant 0 : index
    %82 = vector.load %arg3[%c1_53, %c0_54, %c0_55] : memref<2x128x256xbf16, #tpu.memory_space<vmem>>, vector<1x128x256xbf16>
    %83 = vector.shape_cast %82 : vector<1x128x256xbf16> to vector<128x256xbf16>
    %cst_56 = arith.constant dense<0.000000e+00> : vector<16x256xf32>
    %84 = tpu.matmul %81, %83, %cst_56 {dimension_numbers = #tpu.dot_dimension_numbers<[1], [0], [0], [1], [0, 0, 1, 1], [], []>} : vector<16x128xbf16>, vector<128x256xbf16>, vector<16x256xf32> -> vector<16x256xf32>
    %85 = arith.addf %76, %84 : vector<16x256xf32>
    %86 = vector.extract_strided_slice %85 {offsets = [0, 0], sizes = [16, 128], strides = [1, 1]} : vector<16x256xf32> to vector<16x128xf32>
    %87 = vector.extract_strided_slice %85 {offsets = [0, 128], sizes = [16, 128], strides = [1, 1]} : vector<16x256xf32> to vector<16x128xf32>
    %88 = arith.mulf %86, %86 : vector<16x128xf32>
    %89 = arith.mulf %87, %87 : vector<16x128xf32>
    %90 = arith.addf %88, %89 : vector<16x128xf32>
    %91 = math.sqrt %90 : vector<16x128xf32>
    %c0_57 = arith.constant 0 : index
    %c384 = arith.constant 384 : index
    %92 = vector.load %arg4[%c0_57, %c384] : memref<16x1024xf32, #tpu.memory_space<vmem>>, vector<16x128xf32>
    tpu.vector_store %arg4[%c0_57, %c384], %91 {strides = array<i32>} : memref<16x1024xf32, #tpu.memory_space<vmem>>, vector<16x128xf32>,
    %c4_i32 = arith.constant 4 : i32
    %93 = arith.addi %0, %c4_i32 : i32
    %94 = arith.index_cast %93 : i32 to index
    %c0_58 = arith.constant 0 : index
    %c0_59 = arith.constant 0 : index
    %95 = vector.load %arg2[%94, %c0_58, %c0_59] : memref<9x16x128xbf16, #tpu.memory_space<vmem>>, vector<1x16x128xbf16>
    %96 = vector.shape_cast %95 : vector<1x16x128xbf16> to vector<16x128xbf16>
    %c0_60 = arith.constant 0 : index
    %c0_61 = arith.constant 0 : index
    %c0_62 = arith.constant 0 : index
    %97 = vector.load %arg3[%c0_60, %c0_61, %c0_62] : memref<2x128x256xbf16, #tpu.memory_space<vmem>>, vector<1x128x256xbf16>
    %98 = vector.shape_cast %97 : vector<1x128x256xbf16> to vector<128x256xbf16>
    %cst_63 = arith.constant dense<0.000000e+00> : vector<16x256xf32>
    %99 = tpu.matmul %96, %98, %cst_63 {dimension_numbers = #tpu.dot_dimension_numbers<[1], [0], [0], [1], [0, 0, 1, 1], [], []>} : vector<16x128xbf16>, vector<128x256xbf16>, vector<16x256xf32> -> vector<16x256xf32>
    %c4_i32_64 = arith.constant 4 : i32
    %100 = arith.addi %0, %c4_i32_64 : i32
    %c1_i32_65 = arith.constant 1 : i32
    %101 = arith.addi %100, %c1_i32_65 : i32
    %102 = arith.index_cast %101 : i32 to index
    %c0_66 = arith.constant 0 : index
    %c0_67 = arith.constant 0 : index
    %103 = vector.load %arg2[%102, %c0_66, %c0_67] : memref<9x16x128xbf16, #tpu.memory_space<vmem>>, vector<1x16x128xbf16>
    %104 = vector.shape_cast %103 : vector<1x16x128xbf16> to vector<16x128xbf16>
    %c1_68 = arith.constant 1 : index
    %c0_69 = arith.constant 0 : index
    %c0_70 = arith.constant 0 : index
    %105 = vector.load %arg3[%c1_68, %c0_69, %c0_70] : memref<2x128x256xbf16, #tpu.memory_space<vmem>>, vector<1x128x256xbf16>
    %106 = vector.shape_cast %105 : vector<1x128x256xbf16> to vector<128x256xbf16>
    %cst_71 = arith.constant dense<0.000000e+00> : vector<16x256xf32>
    %107 = tpu.matmul %104, %106, %cst_71 {dimension_numbers = #tpu.dot_dimension_numbers<[1], [0], [0], [1], [0, 0, 1, 1], [], []>} : vector<16x128xbf16>, vector<128x256xbf16>, vector<16x256xf32> -> vector<16x256xf32>
    %108 = arith.addf %99, %107 : vector<16x256xf32>
    %109 = vector.extract_strided_slice %108 {offsets = [0, 0], sizes = [16, 128], strides = [1, 1]} : vector<16x256xf32> to vector<16x128xf32>
    %110 = vector.extract_strided_slice %108 {offsets = [0, 128], sizes = [16, 128], strides = [1, 1]} : vector<16x256xf32> to vector<16x128xf32>
    %111 = arith.mulf %109, %109 : vector<16x128xf32>
    %112 = arith.mulf %110, %110 : vector<16x128xf32>
    %113 = arith.addf %111, %112 : vector<16x128xf32>
    %114 = math.sqrt %113 : vector<16x128xf32>
    %c0_72 = arith.constant 0 : index
    %c512 = arith.constant 512 : index
    %115 = vector.load %arg4[%c0_72, %c512] : memref<16x1024xf32, #tpu.memory_space<vmem>>, vector<16x128xf32>
    tpu.vector_store %arg4[%c0_72, %c512], %114 {strides = array<i32>} : memref<16x1024xf32, #tpu.memory_space<vmem>>, vector<16x128xf32>,
    %c5_i32 = arith.constant 5 : i32
    %116 = arith.addi %0, %c5_i32 : i32
    %117 = arith.index_cast %116 : i32 to index
    %c0_73 = arith.constant 0 : index
    %c0_74 = arith.constant 0 : index
    %118 = vector.load %arg2[%117, %c0_73, %c0_74] : memref<9x16x128xbf16, #tpu.memory_space<vmem>>, vector<1x16x128xbf16>
    %119 = vector.shape_cast %118 : vector<1x16x128xbf16> to vector<16x128xbf16>
    %c0_75 = arith.constant 0 : index
    %c0_76 = arith.constant 0 : index
    %c0_77 = arith.constant 0 : index
    %120 = vector.load %arg3[%c0_75, %c0_76, %c0_77] : memref<2x128x256xbf16, #tpu.memory_space<vmem>>, vector<1x128x256xbf16>
    %121 = vector.shape_cast %120 : vector<1x128x256xbf16> to vector<128x256xbf16>
    %cst_78 = arith.constant dense<0.000000e+00> : vector<16x256xf32>
    %122 = tpu.matmul %119, %121, %cst_78 {dimension_numbers = #tpu.dot_dimension_numbers<[1], [0], [0], [1], [0, 0, 1, 1], [], []>} : vector<16x128xbf16>, vector<128x256xbf16>, vector<16x256xf32> -> vector<16x256xf32>
    %c5_i32_79 = arith.constant 5 : i32
    %123 = arith.addi %0, %c5_i32_79 : i32
    %c1_i32_80 = arith.constant 1 : i32
    %124 = arith.addi %123, %c1_i32_80 : i32
    %125 = arith.index_cast %124 : i32 to index
    %c0_81 = arith.constant 0 : index
    %c0_82 = arith.constant 0 : index
    %126 = vector.load %arg2[%125, %c0_81, %c0_82] : memref<9x16x128xbf16, #tpu.memory_space<vmem>>, vector<1x16x128xbf16>
    %127 = vector.shape_cast %126 : vector<1x16x128xbf16> to vector<16x128xbf16>
    %c1_83 = arith.constant 1 : index
    %c0_84 = arith.constant 0 : index
    %c0_85 = arith.constant 0 : index
    %128 = vector.load %arg3[%c1_83, %c0_84, %c0_85] : memref<2x128x256xbf16, #tpu.memory_space<vmem>>, vector<1x128x256xbf16>
    %129 = vector.shape_cast %128 : vector<1x128x256xbf16> to vector<128x256xbf16>
    %cst_86 = arith.constant dense<0.000000e+00> : vector<16x256xf32>
    %130 = tpu.matmul %127, %129, %cst_86 {dimension_numbers = #tpu.dot_dimension_numbers<[1], [0], [0], [1], [0, 0, 1, 1], [], []>} : vector<16x128xbf16>, vector<128x256xbf16>, vector<16x256xf32> -> vector<16x256xf32>
    %131 = arith.addf %122, %130 : vector<16x256xf32>
    %132 = vector.extract_strided_slice %131 {offsets = [0, 0], sizes = [16, 128], strides = [1, 1]} : vector<16x256xf32> to vector<16x128xf32>
    %133 = vector.extract_strided_slice %131 {offsets = [0, 128], sizes = [16, 128], strides = [1, 1]} : vector<16x256xf32> to vector<16x128xf32>
    %134 = arith.mulf %132, %132 : vector<16x128xf32>
    %135 = arith.mulf %133, %133 : vector<16x128xf32>
    %136 = arith.addf %134, %135 : vector<16x128xf32>
    %137 = math.sqrt %136 : vector<16x128xf32>
    %c0_87 = arith.constant 0 : index
    %c640 = arith.constant 640 : index
    %138 = vector.load %arg4[%c0_87, %c640] : memref<16x1024xf32, #tpu.memory_space<vmem>>, vector<16x128xf32>
    tpu.vector_store %arg4[%c0_87, %c640], %137 {strides = array<i32>} : memref<16x1024xf32, #tpu.memory_space<vmem>>, vector<16x128xf32>,
    %c6_i32 = arith.constant 6 : i32
    %139 = arith.addi %0, %c6_i32 : i32
    %140 = arith.index_cast %139 : i32 to index
    %c0_88 = arith.constant 0 : index
    %c0_89 = arith.constant 0 : index
    %141 = vector.load %arg2[%140, %c0_88, %c0_89] : memref<9x16x128xbf16, #tpu.memory_space<vmem>>, vector<1x16x128xbf16>
    %142 = vector.shape_cast %141 : vector<1x16x128xbf16> to vector<16x128xbf16>
    %c0_90 = arith.constant 0 : index
    %c0_91 = arith.constant 0 : index
    %c0_92 = arith.constant 0 : index
    %143 = vector.load %arg3[%c0_90, %c0_91, %c0_92] : memref<2x128x256xbf16, #tpu.memory_space<vmem>>, vector<1x128x256xbf16>
    %144 = vector.shape_cast %143 : vector<1x128x256xbf16> to vector<128x256xbf16>
    %cst_93 = arith.constant dense<0.000000e+00> : vector<16x256xf32>
    %145 = tpu.matmul %142, %144, %cst_93 {dimension_numbers = #tpu.dot_dimension_numbers<[1], [0], [0], [1], [0, 0, 1, 1], [], []>} : vector<16x128xbf16>, vector<128x256xbf16>, vector<16x256xf32> -> vector<16x256xf32>
    %c6_i32_94 = arith.constant 6 : i32
    %146 = arith.addi %0, %c6_i32_94 : i32
    %c1_i32_95 = arith.constant 1 : i32
    %147 = arith.addi %146, %c1_i32_95 : i32
    %148 = arith.index_cast %147 : i32 to index
    %c0_96 = arith.constant 0 : index
    %c0_97 = arith.constant 0 : index
    %149 = vector.load %arg2[%148, %c0_96, %c0_97] : memref<9x16x128xbf16, #tpu.memory_space<vmem>>, vector<1x16x128xbf16>
    %150 = vector.shape_cast %149 : vector<1x16x128xbf16> to vector<16x128xbf16>
    %c1_98 = arith.constant 1 : index
    %c0_99 = arith.constant 0 : index
    %c0_100 = arith.constant 0 : index
    %151 = vector.load %arg3[%c1_98, %c0_99, %c0_100] : memref<2x128x256xbf16, #tpu.memory_space<vmem>>, vector<1x128x256xbf16>
    %152 = vector.shape_cast %151 : vector<1x128x256xbf16> to vector<128x256xbf16>
    %cst_101 = arith.constant dense<0.000000e+00> : vector<16x256xf32>
    %153 = tpu.matmul %150, %152, %cst_101 {dimension_numbers = #tpu.dot_dimension_numbers<[1], [0], [0], [1], [0, 0, 1, 1], [], []>} : vector<16x128xbf16>, vector<128x256xbf16>, vector<16x256xf32> -> vector<16x256xf32>
    %154 = arith.addf %145, %153 : vector<16x256xf32>
    %155 = vector.extract_strided_slice %154 {offsets = [0, 0], sizes = [16, 128], strides = [1, 1]} : vector<16x256xf32> to vector<16x128xf32>
    %156 = vector.extract_strided_slice %154 {offsets = [0, 128], sizes = [16, 128], strides = [1, 1]} : vector<16x256xf32> to vector<16x128xf32>
    %157 = arith.mulf %155, %155 : vector<16x128xf32>
    %158 = arith.mulf %156, %156 : vector<16x128xf32>
    %159 = arith.addf %157, %158 : vector<16x128xf32>
    %160 = math.sqrt %159 : vector<16x128xf32>
    %c0_102 = arith.constant 0 : index
    %c768 = arith.constant 768 : index
    %161 = vector.load %arg4[%c0_102, %c768] : memref<16x1024xf32, #tpu.memory_space<vmem>>, vector<16x128xf32>
    tpu.vector_store %arg4[%c0_102, %c768], %160 {strides = array<i32>} : memref<16x1024xf32, #tpu.memory_space<vmem>>, vector<16x128xf32>,
    %c7_i32 = arith.constant 7 : i32
    %162 = arith.addi %0, %c7_i32 : i32
    %163 = arith.index_cast %162 : i32 to index
    %c0_103 = arith.constant 0 : index
    %c0_104 = arith.constant 0 : index
    %164 = vector.load %arg2[%163, %c0_103, %c0_104] : memref<9x16x128xbf16, #tpu.memory_space<vmem>>, vector<1x16x128xbf16>
    %165 = vector.shape_cast %164 : vector<1x16x128xbf16> to vector<16x128xbf16>
    %c0_105 = arith.constant 0 : index
    %c0_106 = arith.constant 0 : index
    %c0_107 = arith.constant 0 : index
    %166 = vector.load %arg3[%c0_105, %c0_106, %c0_107] : memref<2x128x256xbf16, #tpu.memory_space<vmem>>, vector<1x128x256xbf16>
    %167 = vector.shape_cast %166 : vector<1x128x256xbf16> to vector<128x256xbf16>
    %cst_108 = arith.constant dense<0.000000e+00> : vector<16x256xf32>
    %168 = tpu.matmul %165, %167, %cst_108 {dimension_numbers = #tpu.dot_dimension_numbers<[1], [0], [0], [1], [0, 0, 1, 1], [], []>} : vector<16x128xbf16>, vector<128x256xbf16>, vector<16x256xf32> -> vector<16x256xf32>
    %c7_i32_109 = arith.constant 7 : i32
    %169 = arith.addi %0, %c7_i32_109 : i32
    %c1_i32_110 = arith.constant 1 : i32
    %170 = arith.addi %169, %c1_i32_110 : i32
    %171 = arith.index_cast %170 : i32 to index
    %c0_111 = arith.constant 0 : index
    %c0_112 = arith.constant 0 : index
    %172 = vector.load %arg2[%171, %c0_111, %c0_112] : memref<9x16x128xbf16, #tpu.memory_space<vmem>>, vector<1x16x128xbf16>
    %173 = vector.shape_cast %172 : vector<1x16x128xbf16> to vector<16x128xbf16>
    %c1_113 = arith.constant 1 : index
    %c0_114 = arith.constant 0 : index
    %c0_115 = arith.constant 0 : index
    %174 = vector.load %arg3[%c1_113, %c0_114, %c0_115] : memref<2x128x256xbf16, #tpu.memory_space<vmem>>, vector<1x128x256xbf16>
    %175 = vector.shape_cast %174 : vector<1x128x256xbf16> to vector<128x256xbf16>
    %cst_116 = arith.constant dense<0.000000e+00> : vector<16x256xf32>
    %176 = tpu.matmul %173, %175, %cst_116 {dimension_numbers = #tpu.dot_dimension_numbers<[1], [0], [0], [1], [0, 0, 1, 1], [], []>} : vector<16x128xbf16>, vector<128x256xbf16>, vector<16x256xf32> -> vector<16x256xf32>
    %177 = arith.addf %168, %176 : vector<16x256xf32>
    %178 = vector.extract_strided_slice %177 {offsets = [0, 0], sizes = [16, 128], strides = [1, 1]} : vector<16x256xf32> to vector<16x128xf32>
    %179 = vector.extract_strided_slice %177 {offsets = [0, 128], sizes = [16, 128], strides = [1, 1]} : vector<16x256xf32> to vector<16x128xf32>
    %180 = arith.mulf %178, %178 : vector<16x128xf32>
    %181 = arith.mulf %179, %179 : vector<16x128xf32>
    %182 = arith.addf %180, %181 : vector<16x128xf32>
    %183 = math.sqrt %182 : vector<16x128xf32>
    %c0_117 = arith.constant 0 : index
    %c896 = arith.constant 896 : index
    %184 = vector.load %arg4[%c0_117, %c896] : memref<16x1024xf32, #tpu.memory_space<vmem>>, vector<16x128xf32>
    tpu.vector_store %arg4[%c0_117, %c896], %183 {strides = array<i32>} : memref<16x1024xf32, #tpu.memory_space<vmem>>, vector<16x128xf32>,
    return
  }
  func.func @transform_0(%arg0: i32, %arg1: i32) -> (i32, i32, i32) {
    %c0_i32 = arith.constant 0 : i32
    %c0_i32_0 = arith.constant 0 : i32
    %c0_i32_1 = arith.constant 0 : i32
    return %c0_i32, %arg0, %c0_i32_0 : i32, i32, i32
  }
  func.func @transform_1(%arg0: i32, %arg1: i32) -> (i32, i32, i32) {
    %c0_i32 = arith.constant 0 : i32
    %c0_i32_0 = arith.constant 0 : i32
    %c0_i32_1 = arith.constant 0 : i32
    %c0_i32_2 = arith.constant 0 : i32
    return %c0_i32, %c0_i32_0, %c0_i32_1 : i32, i32, i32
  }
  func.func @transform_2(%arg0: i32, %arg1: i32) -> (i32, i32) {
    %c0_i32 = arith.constant 0 : i32
    return %arg0, %arg1 : i32, i32
  }
}

</mosaic_0001>

<bundles_post_ra>
// kernel: eeg2vid_encoder_forward.1
= control target key start
LH: loop header
LB: loop body
LE: loop exit
PB: predicated region body
PF: predicated region fallthrough
CT: control target
= control target key end

     0   :  { %v3164_v1 = vmov 0   ;;  %s3868_s1 = inlined_call_operand.vmem [shape: bf16[2,128,256], index: 1, kind: input, shape index: {}]   ;;  %s3869_s0 = inlined_call_operand.vmem [shape: bf16[9,16,128], index: 0, kind: input, shape index: {}]   ;;  %s3870_s2 = inlined_call_operand.vmem [shape: f32[16,1024], index: 2, kind: output, shape index: {}]  }
   0x1   :  { %v3183_v0 = vld [vmem:[%s3868_s1 + $0xf4] ss:$8 sps:$4 sm:$0xff]   ;;  %175 = vmatprep.mubr.bf16.mxu0 %v3164_v1  ;;  %304 = vmatprep.mubr.bf16.mxu1 %v3164_v1  ;;  %v3196_v3 = vld [vmem:[%s3868_s1 + $0xf0] ss:$8 sps:$4 sm:$0xff]   ;;  %v3207_v5 = vld [vmem:[%s3868_s1 + $0xe4] ss:$8 sps:$4 sm:$0xff]  }
   0x2   :  { %v3190_v2 = vld [vmem:[%s3868_s1 + $0x74] ss:$8 sps:$4 sm:$0xff]   ;;  %143 = vmatprep.subr.bf16.mxu0 %v3183_v0  ;;  %v3201_v4 = vld [vmem:[%s3868_s1 + $0x70] ss:$8 sps:$4 sm:$0xff]   ;;  %v3214_v6 = vld [vmem:[%s3868_s1 + $0x64] ss:$8 sps:$4 sm:$0xff]  }
   0x3   :  { %272 = vmatprep.subr.bf16.mxu1 %v3190_v2  ;;  %144 = vmatpush1.bf16.msra.mxu0 %v3196_v3  ;;  %v3219_v7 = vld [vmem:[%s3868_s1 + $0xe0] ss:$8 sps:$4 sm:$0xff]   ;;  %v3231_v9 = vld [vmem:[%s3868_s1 + $0xd4] ss:$8 sps:$4 sm:$0xff]   ;;  %v3241_v11 = vld [vmem:[%s3868_s1 + $0xd0] ss:$8 sps:$4 sm:$0xff]  }
   0x4   :  { %273 = vmatpush1.bf16.msra.mxu1 %v3201_v4  ;;  %145 = vmatprep.subr.bf16.mxu0 %v3207_v5  ;;  %v3225_v8 = vld [vmem:[%s3868_s1 + $0x60] ss:$8 sps:$4 sm:$0xff]   ;;  %v3236_v10 = vld [vmem:[%s3868_s1 + $0x54] ss:$8 sps:$4 sm:$0xff]   ;;  %v3246_v12 = vld [vmem:[%s3868_s1 + $0x50] ss:$8 sps:$4 sm:$0xff]  }
   0x5   :  { %274 = vmatprep.subr.bf16.mxu1 %v3214_v6  ;;  %v3253_v13 = vld [vmem:[%s3868_s1 + $0xc4] ss:$8 sps:$4 sm:$0xff]   ;;  %v3265_v15 = vld [vmem:[%s3868_s1 + $0xc0] ss:$8 sps:$4 sm:$0xff]   ;;  %v3277_v17 = vld [vmem:[%s3868_s1 + $0xb4] ss:$8 sps:$4 sm:$0xff]  }
   0x6   :  { %v3260_v14 = vld [vmem:[%s3868_s1 + $0x44] ss:$8 sps:$4 sm:$0xff]   ;;  %v3272_v16 = vld [vmem:[%s3868_s1 + $0x40] ss:$8 sps:$4 sm:$0xff]   ;;  %v3284_v18 = vld [vmem:[%s3868_s1 + $0x34] ss:$8 sps:$4 sm:$0xff]  }
   0x7   :  { %146 = vmatpush1.bf16.msra.mxu0 %v3219_v7  ;;  %v3289_v19 = vld [vmem:[%s3868_s1 + $0xb0] ss:$8 sps:$4 sm:$0xff]   ;;  %v3301_v21 = vld [vmem:[%s3868_s1 + $0xa4] ss:$8 sps:$4 sm:$0xff]   ;;  %v3313_v23 = vld [vmem:[%s3868_s1 + $0xa0] ss:$8 sps:$4 sm:$0xff]  }
   0x8   :  { %275 = vmatpush1.bf16.msra.mxu1 %v3225_v8  ;;  %147 = vmatprep.subr.bf16.mxu0 %v3231_v9  ;;  %v3294_v20 = vld [vmem:[%s3868_s1 + $0x30] ss:$8 sps:$4 sm:$0xff]   ;;  %v3308_v22 = vld [vmem:[%s3868_s1 + $0x24] ss:$8 sps:$4 sm:$0xff]   ;;  %v3320_v24 = vld [vmem:[%s3868_s1 + $0x20] ss:$8 sps:$4 sm:$0xff]  }
   0x9   :  { %276 = vmatprep.subr.bf16.mxu1 %v3236_v10  ;;  %v3325_v25 = vld [vmem:[%s3868_s1 + $0x94] ss:$8 sps:$4 sm:$0xff]   ;;  %v3337_v27 = vld [vmem:[%s3868_s1 + $0x90] ss:$8 sps:$4 sm:$0xff]   ;;  %v3349_v29 = vld [vmem:[%s3868_s1 + $0x84] ss:$8 sps:$4 sm:$0xff]  }
   0xa   :  { %v3332_v26 = vld [vmem:[%s3868_s1 + $0x14] ss:$8 sps:$4 sm:$0xff]   ;;  %v3342_v28 = vld [vmem:[%s3868_s1 + $0x10] ss:$8 sps:$4 sm:$0xff]   ;;  %v3356_v30 = vld [vmem:[%s3868_s1 + $0x4] ss:$8 sps:$4 sm:$0xff]  }
   0xb   :  { %148 = vmatpush1.bf16.msra.mxu0 %v3241_v11  ;;  %v3361_v31 = vld [vmem:[%s3868_s1 + $0x80] ss:$8 sps:$4 sm:$0xff]   ;;  %v3070_v35 = vld [vmem:[%s3869_s0 + $0x10] sm:$0xff]   ;;  %v3072_v37 = vld [vmem:[%s3869_s0 + $0x18] sm:$0xff]  }
   0xc   :  { %277 = vmatpush1.bf16.msra.mxu1 %v3246_v12  ;;  %149 = vmatprep.subr.bf16.mxu0 %v3253_v13  ;;  %v3368_v32 = vld [vmem:[%s3868_s1] ss:$8 sps:$4 sm:$0xff]   ;;  %v3073_v38 = vld [vmem:[%s3869_s0 + $0x10] sm:$0xff]   ;;  %v3075_v40 = vld [vmem:[%s3869_s0 + $0x18] sm:$0xff]  }
   0xd   :  { %278 = vmatprep.subr.bf16.mxu1 %v3260_v14  ;;  %v3068_v33 = vld [vmem:[%s3869_s0 + $0x8] sm:$0xff]   ;;  %v3069_v34 = vld [vmem:[%s3869_s0] sm:$0xff]   ;;  %v3535_v41 = vld [vmem:[%s3868_s1 + $0xf4] ss:$8 sps:$4 sm:$0xff]  }
   0xe   :  { %v3071_v36 = vld [vmem:[%s3869_s0 + $0x8] sm:$0xff]   ;;  %v3074_v39 = vld [vmem:[%s3869_s0 + $0x20] sm:$0xff]   ;;  %v3540_v42 = vld [vmem:[%s3868_s1 + $0x74] ss:$8 sps:$4 sm:$0xff]  }
   0xf   :  { %150 = vmatpush1.bf16.msra.mxu0 %v3265_v15  ;;  %v3076_v43 = vld [vmem:[%s3869_s0 + $0x28] sm:$0xff]   ;;  %v3077_v44 = vld [vmem:[%s3869_s0 + $0x20] sm:$0xff]   ;;  %v3553_v45 = vld [vmem:[%s3868_s1 + $0xf0] ss:$8 sps:$4 sm:$0xff]  }
  0x10   :  { %279 = vmatpush1.bf16.msra.mxu1 %v3272_v16  ;;  %151 = vmatprep.subr.bf16.mxu0 %v3277_v17  ;;  %v3558_v46 = vld [vmem:[%s3868_s1 + $0x70] ss:$8 sps:$4 sm:$0xff]   ;;  %v3565_v47 = vld [vmem:[%s3868_s1 + $0xe4] ss:$8 sps:$4 sm:$0xff]   ;;  %v3577_v49 = vld [vmem:[%s3868_s1 + $0xe0] ss:$8 sps:$4 sm:$0xff]  }
  0x11   :  { %280 = vmatprep.subr.bf16.mxu1 %v3284_v18  ;;  %v3570_v48 = vld [vmem:[%s3868_s1 + $0x64] ss:$8 sps:$4 sm:$0xff]   ;;  %v3582_v50 = vld [vmem:[%s3868_s1 + $0x60] ss:$8 sps:$4 sm:$0xff]   ;;  %v3589_v51 = vld [vmem:[%s3868_s1 + $0xd4] ss:$8 sps:$4 sm:$0xff]  }
  0x12   :  { %v3594_v52 = vld [vmem:[%s3868_s1 + $0x54] ss:$8 sps:$4 sm:$0xff]   ;;  %v3603_v53 = vld [vmem:[%s3868_s1 + $0xd0] ss:$8 sps:$4 sm:$0xff]   ;;  %v3615_v55 = vld [vmem:[%s3868_s1 + $0xc4] ss:$8 sps:$4 sm:$0xff]  }
  0x13   :  { %152 = vmatpush1.bf16.msra.mxu0 %v3289_v19  ;;  %v3608_v54 = vld [vmem:[%s3868_s1 + $0x50] ss:$8 sps:$4 sm:$0xff]   ;;  %v3620_v56 = vld [vmem:[%s3868_s1 + $0x44] ss:$8 sps:$4 sm:$0xff]   ;;  %v3627_v57 = vld [vmem:[%s3868_s1 + $0xc0] ss:$8 sps:$4 sm:$0xff]  }
  0x14   :  { %281 = vmatpush1.bf16.msra.mxu1 %v3294_v20  ;;  %153 = vmatprep.subr.bf16.mxu0 %v3301_v21  ;;  %v3632_v58 = vld [vmem:[%s3868_s1 + $0x40] ss:$8 sps:$4 sm:$0xff]   ;;  %v3639_v59 = vld [vmem:[%s3868_s1 + $0xb4] ss:$8 sps:$4 sm:$0xff]   ;;  %v3651_v61 = vld [vmem:[%s3868_s1 + $0xb0] ss:$8 sps:$4 sm:$0xff]  }
  0x15   :  { %282 = vmatprep.subr.bf16.mxu1 %v3308_v22  ;;  %v3644_v60 = vld [vmem:[%s3868_s1 + $0x34] ss:$8 sps:$4 sm:$0xff]   ;;  %v3656_v62 = vld [vmem:[%s3868_s1 + $0x30] ss:$8 sps:$4 sm:$0xff]   ;;  %v3663_v63 = vld [vmem:[%s3868_s1 + $0xa4] ss:$8 sps:$4 sm:$0xff]  }
  0x17   :  { %154 = vmatpush1.bf16.msra.mxu0 %v3313_v23 }
  0x18   :  { %283 = vmatpush1.bf16.msra.mxu1 %v3320_v24  ;;  %155 = vmatprep.subr.bf16.mxu0 %v3325_v25 }
  0x19   :  { %284 = vmatprep.subr.bf16.mxu1 %v3332_v26 }
  0x1b   :  { %156 = vmatpush1.bf16.msra.mxu0 %v3337_v27 }
  0x1c   :  { %285 = vmatpush1.bf16.msra.mxu1 %v3342_v28  ;;  %157 = vmatprep.subr.bf16.mxu0 %v3349_v29 }
  0x1d   :  { %286 = vmatprep.subr.bf16.mxu1 %v3356_v30 }
  0x1f   :  { %158 = vmatpush1.bf16.msra.mxu0 %v3361_v31 }
  0x20   :  { %287 = vmatpush1.bf16.msra.mxu1 %v3368_v32  ;;  %463 = vmatprep.subr.bf16.mxu0 %v3183_v0 }
  0x21   :  { %592 = vmatprep.subr.bf16.mxu1 %v3190_v2 }
  0x22   :  { %176 = vmatmul.mubr.bf16.vlgmr.msra.gmra.mxu0 %v3068_v33 }
  0x23   :  { %305 = vmatmul.mubr.bf16.vlgmr.msra.gmra.mxu1 %v3069_v34  ;;  %464 = vmatpush1.bf16.msra.mxu0 %v3196_v3 }
  0x24   :  { %593 = vmatpush1.bf16.msra.mxu1 %v3201_v4  ;;  %465 = vmatprep.subr.bf16.mxu0 %v3207_v5 }
  0x25   :  { %594 = vmatprep.subr.bf16.mxu1 %v3214_v6  ;;  %495 = vmatprep.mubr.bf16.mxu0 %v3164_v1 }
  0x26   :  { %624 = vmatprep.mubr.bf16.mxu1 %v3164_v1 }
  0x27   :  { %466 = vmatpush1.bf16.msra.mxu0 %v3219_v7 }
  0x28   :  { %595 = vmatpush1.bf16.msra.mxu1 %v3225_v8  ;;  %467 = vmatprep.subr.bf16.mxu0 %v3231_v9 }
  0x29   :  { %596 = vmatprep.subr.bf16.mxu1 %v3236_v10 }
  0x2b   :  { %468 = vmatpush1.bf16.msra.mxu0 %v3241_v11 }
  0x2c   :  { %597 = vmatpush1.bf16.msra.mxu1 %v3246_v12  ;;  %469 = vmatprep.subr.bf16.mxu0 %v3253_v13 }
  0x2d   :  { %598 = vmatprep.subr.bf16.mxu1 %v3260_v14 }
  0x2f   :  { %470 = vmatpush1.bf16.msra.mxu0 %v3265_v15 }
  0x30   :  { %599 = vmatpush1.bf16.msra.mxu1 %v3272_v16  ;;  %471 = vmatprep.subr.bf16.mxu0 %v3277_v17 }
  0x31   :  { %600 = vmatprep.subr.bf16.mxu1 %v3284_v18 }
  0x33   :  { %472 = vmatpush1.bf16.msra.mxu0 %v3289_v19 }
  0x34   :  { %601 = vmatpush1.bf16.msra.mxu1 %v3294_v20  ;;  %473 = vmatprep.subr.bf16.mxu0 %v3301_v21 }
  0x35   :  { %602 = vmatprep.subr.bf16.mxu1 %v3308_v22 }
  0x37   :  { %474 = vmatpush1.bf16.msra.mxu0 %v3313_v23 }
  0x38   :  { %603 = vmatpush1.bf16.msra.mxu1 %v3320_v24  ;;  %475 = vmatprep.subr.bf16.mxu0 %v3325_v25 }
  0x39   :  { %604 = vmatprep.subr.bf16.mxu1 %v3332_v26 }
  0x3b   :  { %476 = vmatpush1.bf16.msra.mxu0 %v3337_v27 }
  0x3c   :  { %605 = vmatpush1.bf16.msra.mxu1 %v3342_v28  ;;  %477 = vmatprep.subr.bf16.mxu0 %v3349_v29 }
  0x3d   :  { %606 = vmatprep.subr.bf16.mxu1 %v3356_v30 }
  0x3f   :  { %478 = vmatpush1.bf16.msra.mxu0 %v3361_v31 }
  0x40   :  { %607 = vmatpush1.bf16.msra.mxu1 %v3368_v32  ;;  %783 = vmatprep.subr.bf16.mxu0 %v3183_v0 }
  0x41   :  { %912 = vmatprep.subr.bf16.mxu1 %v3190_v2 }
  0x42   :  { %496 = vmatmul.mubr.bf16.vlgmr.msra.gmra.mxu0 %v3070_v35 }
  0x43   :  { %625 = vmatmul.mubr.bf16.vlgmr.msra.gmra.mxu1 %v3071_v36  ;;  %784 = vmatpush1.bf16.msra.mxu0 %v3196_v3 }
  0x44   :  { %913 = vmatpush1.bf16.msra.mxu1 %v3201_v4  ;;  %785 = vmatprep.subr.bf16.mxu0 %v3207_v5 }
  0x45   :  { %914 = vmatprep.subr.bf16.mxu1 %v3214_v6  ;;  %815 = vmatprep.mubr.bf16.mxu0 %v3164_v1 }
  0x46   :  { %944 = vmatprep.mubr.bf16.mxu1 %v3164_v1 }
  0x47   :  { %786 = vmatpush1.bf16.msra.mxu0 %v3219_v7 }
  0x48   :  { %915 = vmatpush1.bf16.msra.mxu1 %v3225_v8  ;;  %787 = vmatprep.subr.bf16.mxu0 %v3231_v9 }
  0x49   :  { %916 = vmatprep.subr.bf16.mxu1 %v3236_v10 }
  0x4b   :  { %788 = vmatpush1.bf16.msra.mxu0 %v3241_v11 }
  0x4c   :  { %917 = vmatpush1.bf16.msra.mxu1 %v3246_v12  ;;  %789 = vmatprep.subr.bf16.mxu0 %v3253_v13 }
  0x4d   :  { %918 = vmatprep.subr.bf16.mxu1 %v3260_v14 }
  0x4f   :  { %790 = vmatpush1.bf16.msra.mxu0 %v3265_v15 }
  0x50   :  { %919 = vmatpush1.bf16.msra.mxu1 %v3272_v16  ;;  %791 = vmatprep.subr.bf16.mxu0 %v3277_v17 }
  0x51   :  { %920 = vmatprep.subr.bf16.mxu1 %v3284_v18 }
  0x53   :  { %792 = vmatpush1.bf16.msra.mxu0 %v3289_v19 }
  0x54   :  { %921 = vmatpush1.bf16.msra.mxu1 %v3294_v20  ;;  %793 = vmatprep.subr.bf16.mxu0 %v3301_v21 }
  0x55   :  { %922 = vmatprep.subr.bf16.mxu1 %v3308_v22 }
  0x57   :  { %794 = vmatpush1.bf16.msra.mxu0 %v3313_v23 }
  0x58   :  { %923 = vmatpush1.bf16.msra.mxu1 %v3320_v24  ;;  %795 = vmatprep.subr.bf16.mxu0 %v3325_v25 }
  0x59   :  { %924 = vmatprep.subr.bf16.mxu1 %v3332_v26 }
  0x5b   :  { %796 = vmatpush1.bf16.msra.mxu0 %v3337_v27 }
  0x5c   :  { %925 = vmatpush1.bf16.msra.mxu1 %v3342_v28  ;;  %797 = vmatprep.subr.bf16.mxu0 %v3349_v29 }
  0x5d   :  { %926 = vmatprep.subr.bf16.mxu1 %v3356_v30 }
  0x5f   :  { %798 = vmatpush1.bf16.msra.mxu0 %v3361_v31 }
  0x60   :  { %927 = vmatpush1.bf16.msra.mxu1 %v3368_v32  ;;  %1103 = vmatprep.subr.bf16.mxu0 %v3183_v0 }
  0x61   :  { %1232 = vmatprep.subr.bf16.mxu1 %v3190_v2 }
  0x62   :  { %816 = vmatmul.mubr.bf16.vlgmr.msra.gmra.mxu0 %v3072_v37 }
  0x63   :  { %945 = vmatmul.mubr.bf16.vlgmr.msra.gmra.mxu1 %v3073_v38  ;;  %1104 = vmatpush1.bf16.msra.mxu0 %v3196_v3 }
  0x64   :  { %1233 = vmatpush1.bf16.msra.mxu1 %v3201_v4  ;;  %1105 = vmatprep.subr.bf16.mxu0 %v3207_v5 }
  0x65   :  { %1234 = vmatprep.subr.bf16.mxu1 %v3214_v6  ;;  %1135 = vmatprep.mubr.bf16.mxu0 %v3164_v1 }
  0x66   :  { %1264 = vmatprep.mubr.bf16.mxu1 %v3164_v1 }
  0x67   :  { %1106 = vmatpush1.bf16.msra.mxu0 %v3219_v7 }
  0x68   :  { %1235 = vmatpush1.bf16.msra.mxu1 %v3225_v8  ;;  %1107 = vmatprep.subr.bf16.mxu0 %v3231_v9 }
  0x69   :  { %1236 = vmatprep.subr.bf16.mxu1 %v3236_v10 }
  0x6b   :  { %1108 = vmatpush1.bf16.msra.mxu0 %v3241_v11 }
  0x6c   :  { %1237 = vmatpush1.bf16.msra.mxu1 %v3246_v12  ;;  %1109 = vmatprep.subr.bf16.mxu0 %v3253_v13 }
  0x6d   :  { %1238 = vmatprep.subr.bf16.mxu1 %v3260_v14 }
  0x6f   :  { %1110 = vmatpush1.bf16.msra.mxu0 %v3265_v15 }
  0x70   :  { %1239 = vmatpush1.bf16.msra.mxu1 %v3272_v16  ;;  %1111 = vmatprep.subr.bf16.mxu0 %v3277_v17 }
  0x71   :  { %1240 = vmatprep.subr.bf16.mxu1 %v3284_v18 }
  0x73   :  { %1112 = vmatpush1.bf16.msra.mxu0 %v3289_v19 }
  0x74   :  { %1241 = vmatpush1.bf16.msra.mxu1 %v3294_v20  ;;  %1113 = vmatprep.subr.bf16.mxu0 %v3301_v21 }
  0x75   :  { %1242 = vmatprep.subr.bf16.mxu1 %v3308_v22 }
  0x77   :  { %1114 = vmatpush1.bf16.msra.mxu0 %v3313_v23 }
  0x78   :  { %1243 = vmatpush1.bf16.msra.mxu1 %v3320_v24  ;;  %1115 = vmatprep.subr.bf16.mxu0 %v3325_v25 }
  0x79   :  { %1244 = vmatprep.subr.bf16.mxu1 %v3332_v26 }
  0x7b   :  { %1116 = vmatpush1.bf16.msra.mxu0 %v3337_v27 }
  0x7c   :  { %1245 = vmatpush1.bf16.msra.mxu1 %v3342_v28  ;;  %1117 = vmatprep.subr.bf16.mxu0 %v3349_v29 }
  0x7d   :  { %1246 = vmatprep.subr.bf16.mxu1 %v3356_v30 }
  0x7f   :  { %1118 = vmatpush1.bf16.msra.mxu0 %v3361_v31 }
  0x80   :  { %1247 = vmatpush1.bf16.msra.mxu1 %v3368_v32  ;;  %1423 = vmatprep.subr.bf16.mxu0 %v3183_v0  ;;  %v3668_v0 = vld [vmem:[%s3868_s1 + $0x24] ss:$8 sps:$4 sm:$0xff]  }
  0x81   :  { %1552 = vmatprep.subr.bf16.mxu1 %v3190_v2  ;;  %v3675_v2 = vld [vmem:[%s3868_s1 + $0xa0] ss:$8 sps:$4 sm:$0xff]  }
  0x82   :  { %1136 = vmatmul.mubr.bf16.vlgmr.msra.gmra.mxu0 %v3074_v39 }
  0x83   :  { %1265 = vmatmul.mubr.bf16.vlgmr.msra.gmra.mxu1 %v3075_v40  ;;  %1424 = vmatpush1.bf16.msra.mxu0 %v3196_v3  ;;  %v3680_v3 = vld [vmem:[%s3868_s1 + $0x20] ss:$8 sps:$4 sm:$0xff]  }
  0x84   :  { %1553 = vmatpush1.bf16.msra.mxu1 %v3201_v4  ;;  %1425 = vmatprep.subr.bf16.mxu0 %v3207_v5  ;;  %v3687_v4 = vld [vmem:[%s3868_s1 + $0x94] ss:$8 sps:$4 sm:$0xff]   ;;  %v3130_v40 = vld [vmem:[%s3869_s0 + $0x40] sm:$0xff]  }
  0x85   :  { %1554 = vmatprep.subr.bf16.mxu1 %v3214_v6  ;;  %1455 = vmatprep.mubr.bf16.mxu0 %v3164_v1  ;;  %v3692_v5 = vld [vmem:[%s3868_s1 + $0x14] ss:$8 sps:$4 sm:$0xff]   ;;  %v3699_v6 = vld [vmem:[%s3868_s1 + $0x90] ss:$8 sps:$4 sm:$0xff]  }
  0x86   :  { %1584 = vmatprep.mubr.bf16.mxu1 %v3164_v1 }
  0x87   :  { %1426 = vmatpush1.bf16.msra.mxu0 %v3219_v7  ;;  %v3704_v7 = vld [vmem:[%s3868_s1 + $0x10] ss:$8 sps:$4 sm:$0xff]  }
  0x88   :  { %1555 = vmatpush1.bf16.msra.mxu1 %v3225_v8  ;;  %1427 = vmatprep.subr.bf16.mxu0 %v3231_v9  ;;  %v3711_v8 = vld [vmem:[%s3868_s1 + $0x84] ss:$8 sps:$4 sm:$0xff]  }
  0x89   :  { %1556 = vmatprep.subr.bf16.mxu1 %v3236_v10  ;;  %v3716_v9 = vld [vmem:[%s3868_s1 + $0x4] ss:$8 sps:$4 sm:$0xff]   ;;  %v3723_v10 = vld [vmem:[%s3868_s1 + $0x80] ss:$8 sps:$4 sm:$0xff]  }
  0x8b   :  { %1428 = vmatpush1.bf16.msra.mxu0 %v3241_v11  ;;  %v3728_v11 = vld [vmem:[%s3868_s1] ss:$8 sps:$4 sm:$0xff]  }
  0x8c   :  { %1557 = vmatpush1.bf16.msra.mxu1 %v3246_v12  ;;  %1429 = vmatprep.subr.bf16.mxu0 %v3253_v13  ;;  %v3126_v12 = vld [vmem:[%s3869_s0 + $0x30] sm:$0xff]   ;;  %v3127_v13 = vld [vmem:[%s3869_s0 + $0x28] sm:$0xff]  }
  0x8d   :  { %1558 = vmatprep.subr.bf16.mxu1 %v3260_v14  ;;  %v3128_v14 = vld [vmem:[%s3869_s0 + $0x38] sm:$0xff]  }
  0x8f   :  { %1430 = vmatpush1.bf16.msra.mxu0 %v3265_v15  ;;  %v3129_v15 = vld [vmem:[%s3869_s0 + $0x30] sm:$0xff]  }
  0x90   :  { %1559 = vmatpush1.bf16.msra.mxu1 %v3272_v16  ;;  %1431 = vmatprep.subr.bf16.mxu0 %v3277_v17 }
  0x91   :  { %1560 = vmatprep.subr.bf16.mxu1 %v3284_v18 }
  0x93   :  { %1432 = vmatpush1.bf16.msra.mxu0 %v3289_v19 }
  0x94   :  { %1561 = vmatpush1.bf16.msra.mxu1 %v3294_v20  ;;  %1433 = vmatprep.subr.bf16.mxu0 %v3301_v21 }
  0x95   :  { %1562 = vmatprep.subr.bf16.mxu1 %v3308_v22 }
  0x97   :  { %1434 = vmatpush1.bf16.msra.mxu0 %v3313_v23 }
  0x98   :  { %1563 = vmatpush1.bf16.msra.mxu1 %v3320_v24  ;;  %1435 = vmatprep.subr.bf16.mxu0 %v3325_v25 }
  0x99   :  { %1564 = vmatprep.subr.bf16.mxu1 %v3332_v26 }
  0x9b   :  { %1436 = vmatpush1.bf16.msra.mxu0 %v3337_v27 }
  0x9c   :  { %1565 = vmatpush1.bf16.msra.mxu1 %v3342_v28  ;;  %1437 = vmatprep.subr.bf16.mxu0 %v3349_v29 }
  0x9d   :  { %1566 = vmatprep.subr.bf16.mxu1 %v3356_v30 }
  0x9f   :  { %1438 = vmatpush1.bf16.msra.mxu0 %v3361_v31 }
  0xa0   :  { %1567 = vmatpush1.bf16.msra.mxu1 %v3368_v32  ;;  %1743 = vmatprep.subr.bf16.mxu0 %v3535_v41 }
  0xa1   :  { %1872 = vmatprep.subr.bf16.mxu1 %v3540_v42 }
  0xa2   :  { %1456 = vmatmul.mubr.bf16.vlgmr.msra.gmra.mxu0 %v3076_v43 }
  0xa3   :  { %1585 = vmatmul.mubr.bf16.vlgmr.msra.gmra.mxu1 %v3077_v44  ;;  %1744 = vmatpush1.bf16.msra.mxu0 %v3553_v45 }
  0xa4   :  { %1873 = vmatpush1.bf16.msra.mxu1 %v3558_v46  ;;  %1745 = vmatprep.subr.bf16.mxu0 %v3565_v47 }
  0xa5   :  { %1874 = vmatprep.subr.bf16.mxu1 %v3570_v48  ;;  %1775 = vmatprep.mubr.bf16.mxu0 %v3164_v1 }
  0xa6   :  { %1904 = vmatprep.mubr.bf16.mxu1 %v3164_v1 }
  0xa7   :  { %1746 = vmatpush1.bf16.msra.mxu0 %v3577_v49 }
  0xa8   :  { %1875 = vmatpush1.bf16.msra.mxu1 %v3582_v50  ;;  %1747 = vmatprep.subr.bf16.mxu0 %v3589_v51 }
  0xa9   :  { %1876 = vmatprep.subr.bf16.mxu1 %v3594_v52 }
  0xab   :  { %1748 = vmatpush1.bf16.msra.mxu0 %v3603_v53 }
  0xac   :  { %1877 = vmatpush1.bf16.msra.mxu1 %v3608_v54  ;;  %1749 = vmatprep.subr.bf16.mxu0 %v3615_v55 }
  0xad   :  { %1878 = vmatprep.subr.bf16.mxu1 %v3620_v56 }
  0xaf   :  { %1750 = vmatpush1.bf16.msra.mxu0 %v3627_v57 }
  0xb0   :  { %1879 = vmatpush1.bf16.msra.mxu1 %v3632_v58  ;;  %1751 = vmatprep.subr.bf16.mxu0 %v3639_v59 }
  0xb1   :  { %1880 = vmatprep.subr.bf16.mxu1 %v3644_v60 }
  0xb3   :  { %1752 = vmatpush1.bf16.msra.mxu0 %v3651_v61 }
  0xb4   :  { %1881 = vmatpush1.bf16.msra.mxu1 %v3656_v62  ;;  %1753 = vmatprep.subr.bf16.mxu0 %v3663_v63 }
  0xb5   :  { %1882 = vmatprep.subr.bf16.mxu1 %v3668_v0 }
  0xb7   :  { %1754 = vmatpush1.bf16.msra.mxu0 %v3675_v2 }
  0xb8   :  { %1883 = vmatpush1.bf16.msra.mxu1 %v3680_v3  ;;  %1755 = vmatprep.subr.bf16.mxu0 %v3687_v4 }
  0xb9   :  { %1884 = vmatprep.subr.bf16.mxu1 %v3692_v5 }
  0xbb   :  { %1756 = vmatpush1.bf16.msra.mxu0 %v3699_v6 }
  0xbc   :  { %1885 = vmatpush1.bf16.msra.mxu1 %v3704_v7  ;;  %1757 = vmatprep.subr.bf16.mxu0 %v3711_v8 }
  0xbd   :  { %1886 = vmatprep.subr.bf16.mxu1 %v3716_v9 }
  0xbf   :  { %1758 = vmatpush1.bf16.msra.mxu0 %v3723_v10 }
  0xc0   :  { %1887 = vmatpush1.bf16.msra.mxu1 %v3728_v11  ;;  %2063 = vmatprep.subr.bf16.mxu0 %v3535_v41 }
  0xc1   :  { %2192 = vmatprep.subr.bf16.mxu1 %v3540_v42 }
  0xc2   :  { %1776 = vmatmul.mubr.bf16.vlgmr.msra.gmra.mxu0 %v3126_v12 }
  0xc3   :  { %1905 = vmatmul.mubr.bf16.vlgmr.msra.gmra.mxu1 %v3127_v13  ;;  %2064 = vmatpush1.bf16.msra.mxu0 %v3553_v45 }
  0xc4   :  { %2193 = vmatpush1.bf16.msra.mxu1 %v3558_v46  ;;  %2065 = vmatprep.subr.bf16.mxu0 %v3565_v47 }
  0xc5   :  { %2194 = vmatprep.subr.bf16.mxu1 %v3570_v48  ;;  %2095 = vmatprep.mubr.bf16.mxu0 %v3164_v1 }
  0xc6   :  { %2224 = vmatprep.mubr.bf16.mxu1 %v3164_v1 }
  0xc7   :  { %2066 = vmatpush1.bf16.msra.mxu0 %v3577_v49 }
  0xc8   :  { %2195 = vmatpush1.bf16.msra.mxu1 %v3582_v50  ;;  %2067 = vmatprep.subr.bf16.mxu0 %v3589_v51 }
  0xc9   :  { %2196 = vmatprep.subr.bf16.mxu1 %v3594_v52 }
  0xcb   :  { %2068 = vmatpush1.bf16.msra.mxu0 %v3603_v53 }
  0xcc   :  { %2197 = vmatpush1.bf16.msra.mxu1 %v3608_v54  ;;  %2069 = vmatprep.subr.bf16.mxu0 %v3615_v55 }
  0xcd   :  { %2198 = vmatprep.subr.bf16.mxu1 %v3620_v56 }
  0xcf   :  { %2070 = vmatpush1.bf16.msra.mxu0 %v3627_v57 }
  0xd0   :  { %2199 = vmatpush1.bf16.msra.mxu1 %v3632_v58  ;;  %2071 = vmatprep.subr.bf16.mxu0 %v3639_v59 }
  0xd1   :  { %2200 = vmatprep.subr.bf16.mxu1 %v3644_v60 }
  0xd3   :  { %2072 = vmatpush1.bf16.msra.mxu0 %v3651_v61 }
  0xd4   :  { %2201 = vmatpush1.bf16.msra.mxu1 %v3656_v62  ;;  %2073 = vmatprep.subr.bf16.mxu0 %v3663_v63 }
  0xd5   :  { %2202 = vmatprep.subr.bf16.mxu1 %v3668_v0 }
  0xd7   :  { %2074 = vmatpush1.bf16.msra.mxu0 %v3675_v2 }
  0xd8   :  { %2203 = vmatpush1.bf16.msra.mxu1 %v3680_v3  ;;  %2075 = vmatprep.subr.bf16.mxu0 %v3687_v4 }
  0xd9   :  { %2204 = vmatprep.subr.bf16.mxu1 %v3692_v5 }
  0xdb   :  { %2076 = vmatpush1.bf16.msra.mxu0 %v3699_v6 }
  0xdc   :  { %2205 = vmatpush1.bf16.msra.mxu1 %v3704_v7  ;;  %2077 = vmatprep.subr.bf16.mxu0 %v3711_v8 }
  0xdd   :  { %2206 = vmatprep.subr.bf16.mxu1 %v3716_v9 }
  0xdf   :  { %2078 = vmatpush1.bf16.msra.mxu0 %v3723_v10 }
  0xe0   :  { %2207 = vmatpush1.bf16.msra.mxu1 %v3728_v11  ;;  %2383 = vmatprep.subr.bf16.mxu0 %v3535_v41  ;;  %v3131_v41 = vld [vmem:[%s3869_s0 + $0x38] sm:$0xff]  }
  0xe1   :  { %2512 = vmatprep.subr.bf16.mxu1 %v3540_v42 }
  0xe2   :  { %v177_v16 = vpop.f32.mrf.mxu0  ;;  %2096 = vmatmul.mubr.bf16.vlgmr.msra.gmra.mxu0 %v3128_v14 }
  0xe3   :  { %v306_v17 = vpop.f32.mrf.mxu1  ;;  %2225 = vmatmul.mubr.bf16.vlgmr.msra.gmra.mxu1 %v3129_v15  ;;  %2384 = vmatpush1.bf16.msra.mxu0 %v3553_v45 }
  0xe4   :  { %v307_v18 = vadd.f32 %v306_v17, %v177_v16  ;;  %2513 = vmatpush1.bf16.msra.mxu1 %v3558_v46  ;;  %v179_v19 = vpop.f32.mrf.mxu0  ;;  %2385 = vmatprep.subr.bf16.mxu0 %v3565_v47 }
  0xe5   :  { %v308_v20 = vpop.f32.mrf.mxu1  ;;  %2514 = vmatprep.subr.bf16.mxu1 %v3570_v48  ;;  %2415 = vmatprep.mubr.bf16.mxu0 %v3164_v1 }
  0xe6   :  { %v315_v21 = vmul.f32 %v307_v18, %v307_v18  ;;  %v309_v22 = vadd.f32 %v308_v20, %v179_v19  ;;  %2544 = vmatprep.mubr.bf16.mxu1 %v3164_v1  ;;  %v181_v23 = vpop.f32.mrf.mxu0 }
  0xe7   :  { %v310_v24 = vpop.f32.mrf.mxu1  ;;  %2386 = vmatpush1.bf16.msra.mxu0 %v3577_v49 }
  0xe8   :  { %v317_v25 = vmul.f32 %v309_v22, %v309_v22  ;;  %2515 = vmatpush1.bf16.msra.mxu1 %v3582_v50  ;;  %v311_v26 = vadd.f32 %v310_v24, %v181_v23  ;;  %v183_v27 = vpop.f32.mrf.mxu0  ;;  %2387 = vmatprep.subr.bf16.mxu0 %v3589_v51 }
  0xe9   :  { %v312_v28 = vpop.f32.mrf.mxu1  ;;  %2516 = vmatprep.subr.bf16.mxu1 %v3594_v52 }
  0xea   :  { %v319_v29 = vadd.f32 %v317_v25, %v315_v21  ;;  %v313_v30 = vadd.f32 %v312_v28, %v183_v27  ;;  %v316_v1 = vmul.f32 %v311_v26, %v311_v26 }
  0xeb   :  { %2388 = vmatpush1.bf16.msra.mxu0 %v3603_v53 }
  0xec   :  { %3132 = vrsqrt.f32 %v319_v29  ;;  %2517 = vmatpush1.bf16.msra.mxu1 %v3608_v54  ;;  %v318_v31 = vmul.f32 %v313_v30, %v313_v30  ;;  %2389 = vmatprep.subr.bf16.mxu0 %v3615_v55  ;;  %vm323_vm0 = vcmp.eq.f32.partialorder %v319_v29, inf  ;;  %v326_v35 = vand.u32 2147483648, %v319_v29 }
  0xed   :  { %2518 = vmatprep.subr.bf16.mxu1 %v3620_v56  ;;  %vm325_vm1 = vcmp.eq.f32.partialorder %v319_v29, 0.0 }
  0xee   :  { %v320_v32 = vadd.f32 %v318_v31, %v316_v1 }
  0xef   :  { %2390 = vmatpush1.bf16.msra.mxu0 %v3627_v57 }
  0xf0   :  { %2519 = vmatpush1.bf16.msra.mxu1 %v3632_v58  ;;  %3134 = vrsqrt.f32 %v320_v32  ;;  %2391 = vmatprep.subr.bf16.mxu0 %v3639_v59  ;;  %vm330_vm2 = vcmp.eq.f32.partialorder %v320_v32, inf  ;;  %v333_v42 = vand.u32 2147483648, %v320_v32  ;;  %vm332_vm3 = vcmp.eq.f32.partialorder %v320_v32, 0.0 }
  0xf1   :  { %2520 = vmatprep.subr.bf16.mxu1 %v3644_v60 }
  0xf3   :  { %2392 = vmatpush1.bf16.msra.mxu0 %v3651_v61 }
  0xf4   :  { %2521 = vmatpush1.bf16.msra.mxu1 %v3656_v62  ;;  %2393 = vmatprep.subr.bf16.mxu0 %v3663_v63 }
  0xf5   :  { %2522 = vmatprep.subr.bf16.mxu1 %v3668_v0 }
  0xf7   :  { %2394 = vmatpush1.bf16.msra.mxu0 %v3675_v2 }
  0xf8   :  { %2523 = vmatpush1.bf16.msra.mxu1 %v3680_v3  ;;  %2395 = vmatprep.subr.bf16.mxu0 %v3687_v4 }
  0xf9   :  { %v3133_v33 = vpop.eup %3132  ;;  %2524 = vmatprep.subr.bf16.mxu1 %v3692_v5 }
  0xfa   :  { %v322_v34 = vmul.f32 %v3133_v33, %v319_v29 }
  0xfb   :  { %2396 = vmatpush1.bf16.msra.mxu0 %v3699_v6 }
  0xfc   :  { %v324_v36 = vsel %vm323_vm0, %v319_v29, %v322_v34  ;;  %2525 = vmatpush1.bf16.msra.mxu1 %v3704_v7  ;;  %2397 = vmatprep.subr.bf16.mxu0 %v3711_v8 }
  0xfd   :  { %v327_v37 = vsel %vm325_vm1, %v326_v35, %v324_v36  ;;  %2526 = vmatprep.subr.bf16.mxu1 %v3716_v9  ;;  %v3135_v38 = vpop.eup %3134 }
  0xfe   :  { %335 = vst [vmem:[%s3870_s2] sm:$0xff] %v327_v37  ;;  %v329_v39 = vmul.f32 %v3135_v38, %v320_v32 }
  0xff   :  { %2398 = vmatpush1.bf16.msra.mxu0 %v3723_v10 }
 0x100   :  { %2527 = vmatpush1.bf16.msra.mxu1 %v3728_v11  ;;  %v331_v43 = vsel %vm330_vm2, %v320_v32, %v329_v39 }
 0x101   :  { %v334_v44 = vsel %vm332_vm3, %v333_v42, %v331_v43 }
 0x102   :  { %336 = vst [vmem:[%s3870_s2 + $0x40] sm:$0xff] %v334_v44  ;;  %v497_v45 = vpop.f32.mrf.mxu0  ;;  %2416 = vmatmul.mubr.bf16.vlgmr.msra.gmra.mxu0 %v3130_v40 }
 0x103   :  { %v626_v46 = vpop.f32.mrf.mxu1  ;;  %2545 = vmatmul.mubr.bf16.vlgmr.msra.gmra.mxu1 %v3131_v41 }
 0x104   :  { %v627_v47 = vadd.f32 %v626_v46, %v497_v45  ;;  %v499_v48 = vpop.f32.mrf.mxu0 }
 0x105   :  { %v628_v49 = vpop.f32.mrf.mxu1 }
 0x106   :  { %v635_v50 = vmul.f32 %v627_v47, %v627_v47  ;;  %v629_v51 = vadd.f32 %v628_v49, %v499_v48  ;;  %v501_v52 = vpop.f32.mrf.mxu0 }
 0x107   :  { %v630_v53 = vpop.f32.mrf.mxu1 }
 0x108   :  { %v637_v54 = vmul.f32 %v629_v51, %v629_v51  ;;  %v631_v55 = vadd.f32 %v630_v53, %v501_v52  ;;  %v503_v56 = vpop.f32.mrf.mxu0 }
 0x109   :  { %v632_v57 = vpop.f32.mrf.mxu1 }
 0x10a   :  { %v639_v58 = vadd.f32 %v637_v54, %v635_v50  ;;  %v633_v59 = vadd.f32 %v632_v57, %v503_v56  ;;  %v636_v60 = vmul.f32 %v631_v55, %v631_v55 }
 0x10c   :  { %3136 = vrsqrt.f32 %v639_v58  ;;  %v638_v61 = vmul.f32 %v633_v59, %v633_v59  ;;  %vm643_vm4 = vcmp.eq.f32.partialorder %v639_v58, inf  ;;  %v646_v2 = vand.u32 2147483648, %v639_v58 }
 0x10d   :  { %vm645_vm5 = vcmp.eq.f32.partialorder %v639_v58, 0.0 }
 0x10e   :  { %v640_v62 = vadd.f32 %v638_v61, %v636_v60 }
 0x110   :  { %3138 = vrsqrt.f32 %v640_v62  ;;  %vm650_vm6 = vcmp.eq.f32.partialorder %v640_v62, inf  ;;  %v653_v7 = vand.u32 2147483648, %v640_v62  ;;  %vm652_vm7 = vcmp.eq.f32.partialorder %v640_v62, 0.0 }
 0x119   :  { %v3137_v63 = vpop.eup %3136 }
 0x11a   :  { %v642_v0 = vmul.f32 %v3137_v63, %v639_v58 }
 0x11c   :  { %v644_v3 = vsel %vm643_vm4, %v639_v58, %v642_v0 }
 0x11d   :  { %v647_v4 = vsel %vm645_vm5, %v646_v2, %v644_v3  ;;  %v3139_v5 = vpop.eup %3138 }
 0x11e   :  { %655 = vst [vmem:[%s3870_s2 + $0x8] sm:$0xff] %v647_v4  ;;  %v649_v6 = vmul.f32 %v3139_v5, %v640_v62 }
 0x120   :  { %v651_v8 = vsel %vm650_vm6, %v640_v62, %v649_v6 }
 0x121   :  { %v654_v9 = vsel %vm652_vm7, %v653_v7, %v651_v8 }
 0x122   :  { %656 = vst [vmem:[%s3870_s2 + $0x48] sm:$0xff] %v654_v9  ;;  %v817_v10 = vpop.f32.mrf.mxu0 }
 0x123   :  { %v946_v11 = vpop.f32.mrf.mxu1 }
 0x124   :  { %v947_v12 = vadd.f32 %v946_v11, %v817_v10  ;;  %v819_v13 = vpop.f32.mrf.mxu0 }
 0x125   :  { %v948_v14 = vpop.f32.mrf.mxu1 }
 0x126   :  { %v955_v15 = vmul.f32 %v947_v12, %v947_v12  ;;  %v949_v16 = vadd.f32 %v948_v14, %v819_v13  ;;  %v821_v17 = vpop.f32.mrf.mxu0 }
 0x127   :  { %v950_v18 = vpop.f32.mrf.mxu1 }
 0x128   :  { %v957_v19 = vmul.f32 %v949_v16, %v949_v16  ;;  %v951_v20 = vadd.f32 %v950_v18, %v821_v17  ;;  %v823_v21 = vpop.f32.mrf.mxu0 }
 0x129   :  { %v952_v22 = vpop.f32.mrf.mxu1 }
 0x12a   :  { %v959_v23 = vadd.f32 %v957_v19, %v955_v15  ;;  %v953_v24 = vadd.f32 %v952_v22, %v823_v21  ;;  %v956_v25 = vmul.f32 %v951_v20, %v951_v20 }
 0x12c   :  { %3140 = vrsqrt.f32 %v959_v23  ;;  %v958_v26 = vmul.f32 %v953_v24, %v953_v24  ;;  %vm963_vm8 = vcmp.eq.f32.partialorder %v959_v23, inf  ;;  %v966_v30 = vand.u32 2147483648, %v959_v23 }
 0x12d   :  { %vm965_vm9 = vcmp.eq.f32.partialorder %v959_v23, 0.0 }
 0x12e   :  { %v960_v27 = vadd.f32 %v958_v26, %v956_v25 }
 0x130   :  { %3142 = vrsqrt.f32 %v960_v27  ;;  %vm970_vm10 = vcmp.eq.f32.partialorder %v960_v27, inf  ;;  %v973_v34 = vand.u32 2147483648, %v960_v27  ;;  %vm972_vm11 = vcmp.eq.f32.partialorder %v960_v27, 0.0 }
 0x139   :  { %v3141_v28 = vpop.eup %3140 }
 0x13a   :  { %v962_v29 = vmul.f32 %v3141_v28, %v959_v23 }
 0x13c   :  { %v964_v1 = vsel %vm963_vm8, %v959_v23, %v962_v29 }
 0x13d   :  { %v967_v31 = vsel %vm965_vm9, %v966_v30, %v964_v1  ;;  %v3143_v32 = vpop.eup %3142 }
 0x13e   :  { %975 = vst [vmem:[%s3870_s2 + $0x10] sm:$0xff] %v967_v31  ;;  %v969_v33 = vmul.f32 %v3143_v32, %v960_v27 }
 0x140   :  { %v971_v35 = vsel %vm970_vm10, %v960_v27, %v969_v33 }
 0x141   :  { %v974_v36 = vsel %vm972_vm11, %v973_v34, %v971_v35 }
 0x142   :  { %976 = vst [vmem:[%s3870_s2 + $0x50] sm:$0xff] %v974_v36  ;;  %v1137_v37 = vpop.f32.mrf.mxu0 }
 0x143   :  { %v1266_v38 = vpop.f32.mrf.mxu1 }
 0x144   :  { %v1267_v39 = vadd.f32 %v1266_v38, %v1137_v37  ;;  %v1139_v40 = vpop.f32.mrf.mxu0 }
 0x145   :  { %v1268_v41 = vpop.f32.mrf.mxu1 }
 0x146   :  { %v1275_v42 = vmul.f32 %v1267_v39, %v1267_v39  ;;  %v1269_v43 = vadd.f32 %v1268_v41, %v1139_v40  ;;  %v1141_v44 = vpop.f32.mrf.mxu0 }
 0x147   :  { %v1270_v45 = vpop.f32.mrf.mxu1 }
 0x148   :  { %v1277_v46 = vmul.f32 %v1269_v43, %v1269_v43  ;;  %v1271_v47 = vadd.f32 %v1270_v45, %v1141_v44  ;;  %v1143_v48 = vpop.f32.mrf.mxu0 }
 0x149   :  { %v1272_v49 = vpop.f32.mrf.mxu1 }
 0x14a   :  { %v1279_v50 = vadd.f32 %v1277_v46, %v1275_v42  ;;  %v1273_v51 = vadd.f32 %v1272_v49, %v1143_v48  ;;  %v1276_v52 = vmul.f32 %v1271_v47, %v1271_v47 }
 0x14c   :  { %3144 = vrsqrt.f32 %v1279_v50  ;;  %v1278_v53 = vmul.f32 %v1273_v51, %v1273_v51  ;;  %vm1283_vm12 = vcmp.eq.f32.partialorder %v1279_v50, inf  ;;  %v1286_v57 = vand.u32 2147483648, %v1279_v50 }
 0x14d   :  { %vm1285_vm13 = vcmp.eq.f32.partialorder %v1279_v50, 0.0 }
 0x14e   :  { %v1280_v54 = vadd.f32 %v1278_v53, %v1276_v52 }
 0x150   :  { %3146 = vrsqrt.f32 %v1280_v54  ;;  %vm1290_vm14 = vcmp.eq.f32.partialorder %v1280_v54, inf  ;;  %v1293_v62 = vand.u32 2147483648, %v1280_v54  ;;  %vm1292_vm15 = vcmp.eq.f32.partialorder %v1280_v54, 0.0 }
 0x159   :  { %v3145_v55 = vpop.eup %3144 }
 0x15a   :  { %v1282_v56 = vmul.f32 %v3145_v55, %v1279_v50 }
 0x15c   :  { %v1284_v58 = vsel %vm1283_vm12, %v1279_v50, %v1282_v56 }
 0x15d   :  { %v1287_v59 = vsel %vm1285_vm13, %v1286_v57, %v1284_v58  ;;  %v3147_v60 = vpop.eup %3146 }
 0x15e   :  { %1295 = vst [vmem:[%s3870_s2 + $0x18] sm:$0xff] %v1287_v59  ;;  %v1289_v61 = vmul.f32 %v3147_v60, %v1280_v54 }
 0x160   :  { %v1291_v63 = vsel %vm1290_vm14, %v1280_v54, %v1289_v61 }
 0x161   :  { %v1294_v0 = vsel %vm1292_vm15, %v1293_v62, %v1291_v63 }
 0x162   :  { %1296 = vst [vmem:[%s3870_s2 + $0x58] sm:$0xff] %v1294_v0  ;;  %v1457_v2 = vpop.f32.mrf.mxu0 }
 0x163   :  { %v1586_v3 = vpop.f32.mrf.mxu1 }
 0x164   :  { %v1587_v4 = vadd.f32 %v1586_v3, %v1457_v2  ;;  %v1459_v5 = vpop.f32.mrf.mxu0 }
 0x165   :  { %v1588_v6 = vpop.f32.mrf.mxu1 }
 0x166   :  { %v1595_v7 = vmul.f32 %v1587_v4, %v1587_v4  ;;  %v1589_v8 = vadd.f32 %v1588_v6, %v1459_v5  ;;  %v1461_v9 = vpop.f32.mrf.mxu0 }
 0x167   :  { %v1590_v10 = vpop.f32.mrf.mxu1 }
 0x168   :  { %v1597_v11 = vmul.f32 %v1589_v8, %v1589_v8  ;;  %v1591_v12 = vadd.f32 %v1590_v10, %v1461_v9  ;;  %v1463_v13 = vpop.f32.mrf.mxu0 }
 0x169   :  { %v1592_v14 = vpop.f32.mrf.mxu1 }
 0x16a   :  { %v1599_v15 = vadd.f32 %v1597_v11, %v1595_v7  ;;  %v1593_v16 = vadd.f32 %v1592_v14, %v1463_v13  ;;  %v1596_v17 = vmul.f32 %v1591_v12, %v1591_v12 }
 0x16c   :  { %3148 = vrsqrt.f32 %v1599_v15  ;;  %v1598_v18 = vmul.f32 %v1593_v16, %v1593_v16  ;;  %vm1603_vm0 = vcmp.eq.f32.partialorder %v1599_v15, inf  ;;  %v1606_v22 = vand.u32 2147483648, %v1599_v15 }
 0x16d   :  { %vm1605_vm1 = vcmp.eq.f32.partialorder %v1599_v15, 0.0 }
 0x16e   :  { %v1600_v19 = vadd.f32 %v1598_v18, %v1596_v17 }
 0x170   :  { %3150 = vrsqrt.f32 %v1600_v19  ;;  %vm1610_vm2 = vcmp.eq.f32.partialorder %v1600_v19, inf  ;;  %v1613_v27 = vand.u32 2147483648, %v1600_v19  ;;  %vm1612_vm3 = vcmp.eq.f32.partialorder %v1600_v19, 0.0 }
 0x179   :  { %v3149_v20 = vpop.eup %3148 }
 0x17a   :  { %v1602_v21 = vmul.f32 %v3149_v20, %v1599_v15 }
 0x17c   :  { %v1604_v23 = vsel %vm1603_vm0, %v1599_v15, %v1602_v21 }
 0x17d   :  { %v1607_v24 = vsel %vm1605_vm1, %v1606_v22, %v1604_v23  ;;  %v3151_v25 = vpop.eup %3150 }
 0x17e   :  { %1615 = vst [vmem:[%s3870_s2 + $0x20] sm:$0xff] %v1607_v24  ;;  %v1609_v26 = vmul.f32 %v3151_v25, %v1600_v19 }
 0x180   :  { %v1611_v28 = vsel %vm1610_vm2, %v1600_v19, %v1609_v26 }
 0x181   :  { %v1614_v29 = vsel %vm1612_vm3, %v1613_v27, %v1611_v28 }
 0x182   :  { %1616 = vst [vmem:[%s3870_s2 + $0x60] sm:$0xff] %v1614_v29  ;;  %v1777_v30 = vpop.f32.mrf.mxu0 }
 0x183   :  { %v1906_v1 = vpop.f32.mrf.mxu1 }
 0x184   :  { %v1907_v31 = vadd.f32 %v1906_v1, %v1777_v30  ;;  %v1779_v32 = vpop.f32.mrf.mxu0 }
 0x185   :  { %v1908_v33 = vpop.f32.mrf.mxu1 }
 0x186   :  { %v1915_v34 = vmul.f32 %v1907_v31, %v1907_v31  ;;  %v1909_v35 = vadd.f32 %v1908_v33, %v1779_v32  ;;  %v1781_v36 = vpop.f32.mrf.mxu0 }
 0x187   :  { %v1910_v37 = vpop.f32.mrf.mxu1 }
 0x188   :  { %v1917_v38 = vmul.f32 %v1909_v35, %v1909_v35  ;;  %v1911_v39 = vadd.f32 %v1910_v37, %v1781_v36  ;;  %v1783_v40 = vpop.f32.mrf.mxu0 }
 0x189   :  { %v1912_v41 = vpop.f32.mrf.mxu1 }
 0x18a   :  { %v1919_v42 = vadd.f32 %v1917_v38, %v1915_v34  ;;  %v1913_v43 = vadd.f32 %v1912_v41, %v1783_v40  ;;  %v1916_v44 = vmul.f32 %v1911_v39, %v1911_v39 }
 0x18c   :  { %3152 = vrsqrt.f32 %v1919_v42  ;;  %v1918_v45 = vmul.f32 %v1913_v43, %v1913_v43  ;;  %vm1923_vm4 = vcmp.eq.f32.partialorder %v1919_v42, inf  ;;  %v1926_v49 = vand.u32 2147483648, %v1919_v42 }
 0x18d   :  { %vm1925_vm5 = vcmp.eq.f32.partialorder %v1919_v42, 0.0 }
 0x18e   :  { %v1920_v46 = vadd.f32 %v1918_v45, %v1916_v44 }
 0x190   :  { %3154 = vrsqrt.f32 %v1920_v46  ;;  %vm1930_vm6 = vcmp.eq.f32.partialorder %v1920_v46, inf  ;;  %v1933_v54 = vand.u32 2147483648, %v1920_v46  ;;  %vm1932_vm7 = vcmp.eq.f32.partialorder %v1920_v46, 0.0 }
 0x199   :  { %v3153_v47 = vpop.eup %3152 }
 0x19a   :  { %v1922_v48 = vmul.f32 %v3153_v47, %v1919_v42 }
 0x19c   :  { %v1924_v50 = vsel %vm1923_vm4, %v1919_v42, %v1922_v48 }
 0x19d   :  { %v1927_v51 = vsel %vm1925_vm5, %v1926_v49, %v1924_v50  ;;  %v3155_v52 = vpop.eup %3154 }
 0x19e   :  { %1935 = vst [vmem:[%s3870_s2 + $0x28] sm:$0xff] %v1927_v51  ;;  %v1929_v53 = vmul.f32 %v3155_v52, %v1920_v46 }
 0x1a0   :  { %v1931_v55 = vsel %vm1930_vm6, %v1920_v46, %v1929_v53 }
 0x1a1   :  { %v1934_v56 = vsel %vm1932_vm7, %v1933_v54, %v1931_v55 }
 0x1a2   :  { %1936 = vst [vmem:[%s3870_s2 + $0x68] sm:$0xff] %v1934_v56  ;;  %v2097_v57 = vpop.f32.mrf.mxu0 }
 0x1a3   :  { %v2226_v58 = vpop.f32.mrf.mxu1 }
 0x1a4   :  { %v2227_v59 = vadd.f32 %v2226_v58, %v2097_v57  ;;  %v2099_v60 = vpop.f32.mrf.mxu0 }
 0x1a5   :  { %v2228_v61 = vpop.f32.mrf.mxu1 }
 0x1a6   :  { %v2235_v62 = vmul.f32 %v2227_v59, %v2227_v59  ;;  %v2229_v63 = vadd.f32 %v2228_v61, %v2099_v60  ;;  %v2101_v0 = vpop.f32.mrf.mxu0 }
 0x1a7   :  { %v2230_v2 = vpop.f32.mrf.mxu1 }
 0x1a8   :  { %v2237_v3 = vmul.f32 %v2229_v63, %v2229_v63  ;;  %v2231_v4 = vadd.f32 %v2230_v2, %v2101_v0  ;;  %v2103_v5 = vpop.f32.mrf.mxu0 }
 0x1a9   :  { %v2232_v6 = vpop.f32.mrf.mxu1 }
 0x1aa   :  { %v2239_v7 = vadd.f32 %v2237_v3, %v2235_v62  ;;  %v2233_v8 = vadd.f32 %v2232_v6, %v2103_v5  ;;  %v2236_v9 = vmul.f32 %v2231_v4, %v2231_v4 }
 0x1ac   :  { %3156 = vrsqrt.f32 %v2239_v7  ;;  %v2238_v10 = vmul.f32 %v2233_v8, %v2233_v8  ;;  %vm2243_vm8 = vcmp.eq.f32.partialorder %v2239_v7, inf  ;;  %v2246_v14 = vand.u32 2147483648, %v2239_v7 }
 0x1ad   :  { %vm2245_vm9 = vcmp.eq.f32.partialorder %v2239_v7, 0.0 }
 0x1ae   :  { %v2240_v11 = vadd.f32 %v2238_v10, %v2236_v9 }
 0x1b0   :  { %3158 = vrsqrt.f32 %v2240_v11  ;;  %vm2250_vm10 = vcmp.eq.f32.partialorder %v2240_v11, inf  ;;  %v2253_v19 = vand.u32 2147483648, %v2240_v11  ;;  %vm2252_vm11 = vcmp.eq.f32.partialorder %v2240_v11, 0.0 }
 0x1b9   :  { %v3157_v12 = vpop.eup %3156 }
 0x1ba   :  { %v2242_v13 = vmul.f32 %v3157_v12, %v2239_v7 }
 0x1bc   :  { %v2244_v15 = vsel %vm2243_vm8, %v2239_v7, %v2242_v13 }
 0x1bd   :  { %v2247_v16 = vsel %vm2245_vm9, %v2246_v14, %v2244_v15  ;;  %v3159_v17 = vpop.eup %3158 }
 0x1be   :  { %2255 = vst [vmem:[%s3870_s2 + $0x30] sm:$0xff] %v2247_v16  ;;  %v2249_v18 = vmul.f32 %v3159_v17, %v2240_v11 }
 0x1c0   :  { %v2251_v20 = vsel %vm2250_vm10, %v2240_v11, %v2249_v18 }
 0x1c1   :  { %v2254_v21 = vsel %vm2252_vm11, %v2253_v19, %v2251_v20 }
 0x1c2   :  { %2256 = vst [vmem:[%s3870_s2 + $0x70] sm:$0xff] %v2254_v21  ;;  %v2417_v22 = vpop.f32.mrf.mxu0 }
 0x1c3   :  { %v2546_v23 = vpop.f32.mrf.mxu1 }
 0x1c4   :  { %v2547_v24 = vadd.f32 %v2546_v23, %v2417_v22  ;;  %v2419_v25 = vpop.f32.mrf.mxu0 }
 0x1c5   :  { %v2548_v26 = vpop.f32.mrf.mxu1 }
 0x1c6   :  { %v2549_v27 = vadd.f32 %v2548_v26, %v2419_v25  ;;  %v2421_v28 = vpop.f32.mrf.mxu0  ;;  %v2555_v30 = vmul.f32 %v2547_v24, %v2547_v24 }
 0x1c7   :  { %v2550_v29 = vpop.f32.mrf.mxu1 }
 0x1c8   :  { %v2557_v1 = vmul.f32 %v2549_v27, %v2549_v27  ;;  %v2551_v31 = vadd.f32 %v2550_v29, %v2421_v28  ;;  %v2423_v32 = vpop.f32.mrf.mxu0 }
 0x1c9   :  { %v2552_v33 = vpop.f32.mrf.mxu1 }
 0x1ca   :  { %v2559_v34 = vadd.f32 %v2557_v1, %v2555_v30  ;;  %v2553_v35 = vadd.f32 %v2552_v33, %v2423_v32  ;;  %v2556_v36 = vmul.f32 %v2551_v31, %v2551_v31 }
 0x1cc   :  { %3160 = vrsqrt.f32 %v2559_v34  ;;  %v2558_v37 = vmul.f32 %v2553_v35, %v2553_v35  ;;  %vm2563_vm12 = vcmp.eq.f32.partialorder %v2559_v34, inf  ;;  %v2566_v41 = vand.u32 2147483648, %v2559_v34 }
 0x1cd   :  { %vm2565_vm13 = vcmp.eq.f32.partialorder %v2559_v34, 0.0 }
 0x1ce   :  { %v2560_v38 = vadd.f32 %v2558_v37, %v2556_v36 }
 0x1d0   :  { %3162 = vrsqrt.f32 %v2560_v38  ;;  %vm2570_vm14 = vcmp.eq.f32.partialorder %v2560_v38, inf  ;;  %v2573_v46 = vand.u32 2147483648, %v2560_v38  ;;  %vm2572_vm15 = vcmp.eq.f32.partialorder %v2560_v38, 0.0 }
 0x1d9   :  { %v3161_v39 = vpop.eup %3160 }
 0x1da   :  { %v2562_v40 = vmul.f32 %v3161_v39, %v2559_v34 }
 0x1dc   :  { %v2564_v42 = vsel %vm2563_vm12, %v2559_v34, %v2562_v40 }
 0x1dd   :  { %v2567_v43 = vsel %vm2565_vm13, %v2566_v41, %v2564_v42  ;;  %v3163_v44 = vpop.eup %3162 }
 0x1de   :  { %2575 = vst [vmem:[%s3870_s2 + $0x38] sm:$0xff] %v2567_v43  ;;  %v2569_v45 = vmul.f32 %v3163_v44, %v2560_v38 }
 0x1e0   :  { %v2571_v47 = vsel %vm2570_vm14, %v2560_v38, %v2569_v45 }
 0x1e1   :  { %v2574_v48 = vsel %vm2572_vm15, %v2573_v46, %v2571_v47 }
 0x1e2   :  { %2576 = vst [vmem:[%s3870_s2 + $0x78] sm:$0xff] %v2574_v48 }

</bundles_post_ra>
